<compile_context>
chip_gen: v7x
topology: tpu7x:2x2x1
jax: 0.10.0
libtpu: 0.0.40
codegen_flags: <defaults>
</compile_context>

<pallas_src>
import functools

import jax
import jax.numpy as jnp
from jax.experimental import pallas as pl
from jax.experimental.pallas import tpu as pltpu


def _wdsr_kernel(x_ref, res_ref, w1_ref, b1_ref, w2_ref, b2_ref, o_ref,
                 *, TH, W, C, n_row_tiles):
    """One (batch, row-tile) grid step.

    x_ref  : (TH+4, W+2, C)   bf16  NHWC input window (rows padded by 2, cols by 1)
    res_ref: (C, TH*W)        f32   residual, original NCHW layout (lane-dense)
    w1_ref : (9*C, 4*C)       bf16  conv1 weights, im2col-packed
    b1_ref : (1, 4*C)         f32
    w2_ref : (36*C, C)        bf16  conv2 weights, im2col-packed
    b2_ref : (1, C)           f32
    o_ref  : (C, TH*W)        f32   output, NCHW layout (lane-dense along TH*W)
    """
    C4 = 4 * C
    Hm = TH + 2            # conv1 output rows needed (1-row halo each side)
    Nm = Hm * W
    No = TH * W

    x = x_ref[...]                                            # (TH+4, W+2, C) bf16

    # ---- conv1: single fused im2col matmul, K = 9*C ----
    col1 = jnp.concatenate(
        [x[dy:dy + Hm, dx:dx + W, :] for dy in range(3) for dx in range(3)],
        axis=-1).reshape(Nm, 9 * C)                           # (Nm, 9C) bf16
    h1 = jnp.dot(col1, w1_ref[...], preferred_element_type=jnp.float32)
    h1 = jnp.maximum(h1 + b1_ref[...], 0.0)                   # bias + ReLU, f32

    # ---- conv2 input: conv1 output + SAME zero ring, built in registers ----
    # Rows -1 / H exist only at the true image top/bottom; interior halo rows
    # are genuine conv1 outputs.  Columns -1 / W are always zero.
    mid_body = h1.reshape(Hm, W, C4)
    row_ids = jax.lax.broadcasted_iota(jnp.int32, (Hm, W, C4), 0)
    top_zero_row = jnp.where(pl.program_id(1) == 0, 0, -1)
    bot_zero_row = jnp.where(pl.program_id(1) == n_row_tiles - 1, Hm - 1, -1)
    zero_mask = (row_ids == top_zero_row) | (row_ids == bot_zero_row)
    mid_body = jnp.where(zero_mask, 0.0, mid_body).astype(jnp.bfloat16)
    zcol = jnp.zeros((Hm, 1, C4), dtype=jnp.bfloat16)
    mid = jnp.concatenate([zcol, mid_body, zcol], axis=1)     # (Hm, W+2, 4C) bf16

    # ---- conv2: single fused im2col matmul, K = 36*C ----
    col2 = jnp.concatenate(
        [mid[dy:dy + TH, dx:dx + W, :] for dy in range(3) for dx in range(3)],
        axis=-1).reshape(No, 9 * C4)                          # (No, 36C) bf16
    h2 = jnp.dot(col2, w2_ref[...], preferred_element_type=jnp.float32)
    h2 = h2 + b2_ref[...]                                     # (No, C) f32

    # ---- channel-major output (lanes = TH*W), residual add, store ----
    o_ref[...] = (h2.T + res_ref[...]).astype(o_ref.dtype)    # (C, No)


def _pick_row_tile(H, W, C, budget_bytes=6 * 1024 * 1024):
    """Largest divisor of H whose per-step working set fits the VMEM budget and
    keeps the output lane dim (TH*W) 128-aligned.  Prefer >= 2 row tiles so the
    pipeline / megacore has depth.  Re-derive the budget on v7x (64 MiB/TC)."""
    def vmem_cost(th):
        x_tile = (th + 4) * (W + 2) * C * 2                   # bf16 input window
        res    = C * th * W * 4                               # f32 residual block
        out    = C * th * W * 4                               # f32 output block
        mid    = (th + 2) * (W + 2) * 4 * C * 2               # bf16 intermediate
        cols   = (th + 2) * W * 9 * C * 2 + th * W * 36 * C * 2
        return 2 * (x_tile + res + out) + mid + cols          # x2 = double buffer
    cands = [d for d in range(1, H + 1)
             if H % d == 0 and (d == H or (d * W) % 128 == 0)]
    fitting = [d for d in cands if vmem_cost(d) <= budget_bytes] or [cands[0]]
    th = max(fitting)
    if th == H and len(fitting) > 1:
        th = fitting[-2]
    return th


def wdsr_block_nchw(x_nchw, w1, b1, w2, b2, *, row_tile=None):
    """x_nchw: (B, C, H, W) f32.  Conv weights in HWIO (kh, kw, Cin, Cout)
    (i.e. PyTorch (Cout, Cin, kh, kw) transposed); biases 1-D."""
    B, C, H, W = x_nchw.shape
    C4 = 4 * C
    TH = row_tile if row_tile is not None else _pick_row_tile(H, W, C)
    assert H % TH == 0
    n_tiles = H // TH

    x_f32 = x_nchw.astype(jnp.float32)

    # Conv path: NHWC bf16, rows padded by 2 (conv1 + conv2 halo), cols by 1
    # (conv1 halo only; conv2's zero column halo is synthesized in-kernel).
    x_nhwc = jnp.transpose(x_f32, (0, 2, 3, 1)).astype(jnp.bfloat16)
    x_pad = jnp.pad(x_nhwc, ((0, 0), (2, 2), (1, 1), (0, 0)))
    # Overlapping row windows (halo recompute): (B, n_tiles, TH+4, W+2, C).
    x_tiles = jnp.stack(
        [x_pad[:, t * TH:t * TH + TH + 4] for t in range(n_tiles)], axis=1)

    # Residual path stays in the original NCHW layout, full f32.
    x_res = x_f32.reshape(B, C, H * W)

    w1p = w1.reshape(9 * C, C4).astype(jnp.bfloat16)          # im2col packing
    w2p = w2.reshape(9 * C4, C).astype(jnp.bfloat16)
    b1_2d = b1.reshape(1, C4).astype(jnp.float32)
    b2_2d = b2.reshape(1, C).astype(jnp.float32)

    kernel = functools.partial(_wdsr_kernel, TH=TH, W=W, C=C,
                               n_row_tiles=n_tiles)

    out_flat = pl.pallas_call(
        kernel,
        out_shape=jax.ShapeDtypeStruct((B, C, H * W), jnp.float32),
        grid_spec=pltpu.PrefetchScalarGridSpec(
            num_scalar_prefetch=0,
            grid=(B, n_tiles),
            in_specs=[
                pl.BlockSpec((pl.Squeezed(), pl.Squeezed(), TH + 4, W + 2, C),
                             lambda b, h: (b, h, 0, 0, 0)),
                pl.BlockSpec((pl.Squeezed(), C, TH * W),
                             lambda b, h: (b, 0, h)),
                pl.BlockSpec((9 * C, C4), lambda b, h: (0, 0)),
                pl.BlockSpec((1, C4), lambda b, h: (0, 0)),
                pl.BlockSpec((9 * C4, C), lambda b, h: (0, 0)),
                pl.BlockSpec((1, C), lambda b, h: (0, 0)),
            ],
            out_specs=pl.BlockSpec((pl.Squeezed(), C, TH * W),
                                   lambda b, h: (b, 0, h)),
        ),
        compiler_params=pltpu.CompilerParams(
            dimension_semantics=("parallel", "parallel"),
            vmem_limit_bytes=32 * 1024 * 1024,
        ),
    )(x_tiles, x_res, w1p, b1_2d, w2p, b2_2d)

    return out_flat.reshape(B, C, H, W)                       # already NCHW


def _reference_nchw(x_conv_nchw, residual_nchw, w1, b1, w2, b2):
    """Plain-JAX reference (lax conv, NHWC/HWIO); residual passed separately."""
    x = jnp.transpose(x_conv_nchw, (0, 2, 3, 1))
    dn1 = jax.lax.conv_dimension_numbers(x.shape, w1.shape,
                                         ("NHWC", "HWIO", "NHWC"))
    h = jax.lax.conv_general_dilated(x, w1, (1, 1), "SAME",
                                     dimension_numbers=dn1) + b1
    h = jnp.maximum(h, 0.0)
    dn2 = jax.lax.conv_dimension_numbers(h.shape, w2.shape,
                                         ("NHWC", "HWIO", "NHWC"))
    y = jax.lax.conv_general_dilated(h, w2, (1, 1), "SAME",
                                     dimension_numbers=dn2) + b2
    return jnp.transpose(y, (0, 3, 1, 2)) + residual_nchw


if __name__ == "__main__":
    B, C, H, W = 2, 4, 16, 16
    key = jax.random.PRNGKey(0)
    kx, k1, k2, k3, k4 = jax.random.split(key, 5)

    x = jax.random.normal(kx, (B, C, H, W), dtype=jnp.float32)

    # Deterministic params, shapes matching nn.Conv2d(C,4C,3) / nn.Conv2d(4C,C,3),
    # stored in HWIO (kh, kw, Cin, Cout).
    fan1 = C * 3 * 3
    fan2 = 4 * C * 3 * 3
    bound1 = 1.0 / fan1 ** 0.5
    bound2 = 1.0 / fan2 ** 0.5
    w1 = jax.random.uniform(k1, (3, 3, C, 4 * C), jnp.float32, -bound1, bound1)
    b1 = jax.random.uniform(k2, (4 * C,), jnp.float32, -bound1, bound1)
    w2 = jax.random.uniform(k3, (3, 3, 4 * C, C), jnp.float32, -bound2, bound2)
    b2 = jax.random.uniform(k4, (C,), jnp.float32, -bound2, bound2)

    out = jax.block_until_ready(wdsr_block_nchw(x, w1, b1, w2, b2))

    # Reference in f32 on the bf16-rounded conv operands the kernel consumes
    # (residual is taken from the original f32 x, same as the kernel does).
    x_q = x.astype(jnp.bfloat16).astype(jnp.float32)
    w1_q = w1.astype(jnp.bfloat16).astype(jnp.float32)
    w2_q = w2.astype(jnp.bfloat16).astype(jnp.float32)
    ref = _reference_nchw(x_q, x, w1_q, b1, w2_q, b2)

    assert out.shape == (B, C, H, W)
    max_err = float(jnp.max(jnp.abs(out - ref)))
    assert jnp.allclose(out, ref, atol=2e-2, rtol=2e-2), (
        f"mismatch vs reference (max abs err {max_err})")

    print("KERNEL_OK")
</pallas_src>

<mosaic_0001>
module attributes {stable_mosaic.version = 11 : i64} {
  func.func @_wdsr_kernel(%arg0: i32, %arg1: i32, %arg2: memref<1x1x12x18x4xbf16, #tpu.memory_space<vmem>>, %arg3: memref<1x4x128xf32, #tpu.memory_space<vmem>>, %arg4: memref<36x16xbf16, #tpu.memory_space<vmem>>, %arg5: memref<1x16xf32, #tpu.memory_space<vmem>>, %arg6: memref<144x4xbf16, #tpu.memory_space<vmem>>, %arg7: memref<1x4xf32, #tpu.memory_space<vmem>>, %arg8: memref<1x4x128xf32, #tpu.memory_space<vmem>>) attributes {dimension_semantics = [#tpu.dimension_semantics<parallel>, #tpu.dimension_semantics<parallel>], iteration_bounds = array<i64: 2, 2>, scalar_prefetch = 0 : i64, scratch_operands = 0 : i64, tpu.core_type = #tpu.core_type<tc>, window_params = [{transform_indices = @transform_0, window_bounds = array<i64: 1, 1, 12, 18, 4>}, {transform_indices = @transform_1, window_bounds = array<i64: 1, 4, 128>}, {pipeline_mode = #tpu.pipeline_mode<synchronous>, transform_indices = @transform_2, window_bounds = array<i64: 36, 16>}, {pipeline_mode = #tpu.pipeline_mode<synchronous>, transform_indices = @transform_3, window_bounds = array<i64: 1, 16>}, {pipeline_mode = #tpu.pipeline_mode<synchronous>, transform_indices = @transform_4, window_bounds = array<i64: 144, 4>}, {pipeline_mode = #tpu.pipeline_mode<synchronous>, transform_indices = @transform_5, window_bounds = array<i64: 1, 4>}, {transform_indices = @transform_6, window_bounds = array<i64: 1, 4, 128>}]} {
    %c0 = arith.constant 0 : index
    %c0_0 = arith.constant 0 : index
    %c0_1 = arith.constant 0 : index
    %c0_2 = arith.constant 0 : index
    %c0_3 = arith.constant 0 : index
    %0 = vector.load %arg2[%c0, %c0_0, %c0_1, %c0_2, %c0_3] : memref<1x1x12x18x4xbf16, #tpu.memory_space<vmem>>, vector<1x1x12x18x4xbf16>
    %1 = vector.shape_cast %0 : vector<1x1x12x18x4xbf16> to vector<12x18x4xbf16>
    %2 = vector.extract_strided_slice %1 {offsets = [0, 0, 0], sizes = [10, 16, 4], strides = [1, 1, 1]} : vector<12x18x4xbf16> to vector<10x16x4xbf16>
    %3 = vector.extract_strided_slice %1 {offsets = [0, 1, 0], sizes = [10, 16, 4], strides = [1, 1, 1]} : vector<12x18x4xbf16> to vector<10x16x4xbf16>
    %4 = vector.extract_strided_slice %1 {offsets = [0, 2, 0], sizes = [10, 16, 4], strides = [1, 1, 1]} : vector<12x18x4xbf16> to vector<10x16x4xbf16>
    %5 = vector.extract_strided_slice %1 {offsets = [1, 0, 0], sizes = [10, 16, 4], strides = [1, 1, 1]} : vector<12x18x4xbf16> to vector<10x16x4xbf16>
    %6 = vector.extract_strided_slice %1 {offsets = [1, 1, 0], sizes = [10, 16, 4], strides = [1, 1, 1]} : vector<12x18x4xbf16> to vector<10x16x4xbf16>
    %7 = vector.extract_strided_slice %1 {offsets = [1, 2, 0], sizes = [10, 16, 4], strides = [1, 1, 1]} : vector<12x18x4xbf16> to vector<10x16x4xbf16>
    %8 = vector.extract_strided_slice %1 {offsets = [2, 0, 0], sizes = [10, 16, 4], strides = [1, 1, 1]} : vector<12x18x4xbf16> to vector<10x16x4xbf16>
    %9 = vector.extract_strided_slice %1 {offsets = [2, 1, 0], sizes = [10, 16, 4], strides = [1, 1, 1]} : vector<12x18x4xbf16> to vector<10x16x4xbf16>
    %10 = vector.extract_strided_slice %1 {offsets = [2, 2, 0], sizes = [10, 16, 4], strides = [1, 1, 1]} : vector<12x18x4xbf16> to vector<10x16x4xbf16>
    %11 = tpu.concatenate %2, %3, %4, %5, %6, %7, %8, %9, %10 in 2 : vector<10x16x4xbf16>, vector<10x16x4xbf16>, vector<10x16x4xbf16>, vector<10x16x4xbf16>, vector<10x16x4xbf16>, vector<10x16x4xbf16>, vector<10x16x4xbf16>, vector<10x16x4xbf16>, vector<10x16x4xbf16> -> vector<10x16x36xbf16>
    %12 = vector.shape_cast %11 : vector<10x16x36xbf16> to vector<160x36xbf16>
    %c0_4 = arith.constant 0 : index
    %c0_5 = arith.constant 0 : index
    %13 = vector.load %arg4[%c0_4, %c0_5] : memref<36x16xbf16, #tpu.memory_space<vmem>>, vector<36x16xbf16>
    %cst = arith.constant dense<0.000000e+00> : vector<160x16xf32>
    %14 = tpu.matmul %12, %13, %cst {dimension_numbers = #tpu.dot_dimension_numbers<[1], [0], [0], [1], [0, 0, 1, 1], [], []>} : vector<160x36xbf16>, vector<36x16xbf16>, vector<160x16xf32> -> vector<160x16xf32>
    %c0_6 = arith.constant 0 : index
    %c0_7 = arith.constant 0 : index
    %15 = vector.load %arg5[%c0_6, %c0_7] : memref<1x16xf32, #tpu.memory_space<vmem>>, vector<1x16xf32>
    %16 = vector.broadcast %15 : vector<1x16xf32> to vector<160x16xf32>
    %17 = arith.addf %14, %16 : vector<160x16xf32>
    %cst_8 = arith.constant 0.000000e+00 : f32
    %18 = vector.broadcast %cst_8 : f32 to vector<160x16xf32>
    %19 = arith.maximumf %17, %18 : vector<160x16xf32>
    %20 = vector.shape_cast %19 : vector<160x16xf32> to vector<10x16x16xf32>
    %21 = tpu.iota {dimensions = array<i32: 0>} : vector<10x16x16xi32>
    %c0_i32 = arith.constant 0 : i32
    %22 = arith.cmpi eq, %arg1, %c0_i32 : i32
    %c0_i32_9 = arith.constant 0 : i32
    %c-1_i32 = arith.constant -1 : i32
    %23 = arith.select %22, %c0_i32_9, %c-1_i32 : i32
    %c1_i32 = arith.constant 1 : i32
    %24 = arith.cmpi eq, %arg1, %c1_i32 : i32
    %c9_i32 = arith.constant 9 : i32
    %c-1_i32_10 = arith.constant -1 : i32
    %25 = arith.select %24, %c9_i32, %c-1_i32_10 : i32
    %26 = vector.broadcast %23 : i32 to vector<10x16x16xi32>
    %27 = arith.cmpi eq, %21, %26 : vector<10x16x16xi32>
    %28 = vector.broadcast %25 : i32 to vector<10x16x16xi32>
    %29 = arith.cmpi eq, %21, %28 : vector<10x16x16xi32>
    %30 = arith.ori %27, %29 : vector<10x16x16xi1>
    %cst_11 = arith.constant 0.000000e+00 : f32
    %31 = vector.broadcast %cst_11 : f32 to vector<10x16x16xf32>
    %32 = arith.select %30, %31, %20 : vector<10x16x16xi1>, vector<10x16x16xf32>
    %33 = arith.truncf %32 : vector<10x16x16xf32> to vector<10x16x16xbf16>
    %cst_12 = arith.constant 0.000000e+00 : bf16
    %34 = vector.broadcast %cst_12 : bf16 to vector<10x1x16xbf16>
    %35 = tpu.concatenate %34, %33, %34 in 1 : vector<10x1x16xbf16>, vector<10x16x16xbf16>, vector<10x1x16xbf16> -> vector<10x18x16xbf16>
    %36 = vector.extract_strided_slice %35 {offsets = [0, 0, 0], sizes = [8, 16, 16], strides = [1, 1, 1]} : vector<10x18x16xbf16> to vector<8x16x16xbf16>
    %37 = vector.extract_strided_slice %35 {offsets = [0, 1, 0], sizes = [8, 16, 16], strides = [1, 1, 1]} : vector<10x18x16xbf16> to vector<8x16x16xbf16>
    %38 = vector.extract_strided_slice %35 {offsets = [0, 2, 0], sizes = [8, 16, 16], strides = [1, 1, 1]} : vector<10x18x16xbf16> to vector<8x16x16xbf16>
    %39 = vector.extract_strided_slice %35 {offsets = [1, 0, 0], sizes = [8, 16, 16], strides = [1, 1, 1]} : vector<10x18x16xbf16> to vector<8x16x16xbf16>
    %40 = vector.extract_strided_slice %35 {offsets = [1, 1, 0], sizes = [8, 16, 16], strides = [1, 1, 1]} : vector<10x18x16xbf16> to vector<8x16x16xbf16>
    %41 = vector.extract_strided_slice %35 {offsets = [1, 2, 0], sizes = [8, 16, 16], strides = [1, 1, 1]} : vector<10x18x16xbf16> to vector<8x16x16xbf16>
    %42 = vector.extract_strided_slice %35 {offsets = [2, 0, 0], sizes = [8, 16, 16], strides = [1, 1, 1]} : vector<10x18x16xbf16> to vector<8x16x16xbf16>
    %43 = vector.extract_strided_slice %35 {offsets = [2, 1, 0], sizes = [8, 16, 16], strides = [1, 1, 1]} : vector<10x18x16xbf16> to vector<8x16x16xbf16>
    %44 = vector.extract_strided_slice %35 {offsets = [2, 2, 0], sizes = [8, 16, 16], strides = [1, 1, 1]} : vector<10x18x16xbf16> to vector<8x16x16xbf16>
    %45 = tpu.concatenate %36, %37, %38, %39, %40, %41, %42, %43, %44 in 2 : vector<8x16x16xbf16>, vector<8x16x16xbf16>, vector<8x16x16xbf16>, vector<8x16x16xbf16>, vector<8x16x16xbf16>, vector<8x16x16xbf16>, vector<8x16x16xbf16>, vector<8x16x16xbf16>, vector<8x16x16xbf16> -> vector<8x16x144xbf16>
    %46 = vector.shape_cast %45 : vector<8x16x144xbf16> to vector<128x144xbf16>
    %c0_13 = arith.constant 0 : index
    %c0_14 = arith.constant 0 : index
    %47 = vector.load %arg6[%c0_13, %c0_14] : memref<144x4xbf16, #tpu.memory_space<vmem>>, vector<144x4xbf16>
    %cst_15 = arith.constant dense<0.000000e+00> : vector<128x4xf32>
    %48 = tpu.matmul %46, %47, %cst_15 {dimension_numbers = #tpu.dot_dimension_numbers<[1], [0], [0], [1], [0, 0, 1, 1], [], []>} : vector<128x144xbf16>, vector<144x4xbf16>, vector<128x4xf32> -> vector<128x4xf32>
    %c0_16 = arith.constant 0 : index
    %c0_17 = arith.constant 0 : index
    %49 = vector.load %arg7[%c0_16, %c0_17] : memref<1x4xf32, #tpu.memory_space<vmem>>, vector<1x4xf32>
    %50 = vector.broadcast %49 : vector<1x4xf32> to vector<128x4xf32>
    %51 = arith.addf %48, %50 : vector<128x4xf32>
    %52 = tpu.transpose %51, [1, 0] : vector<128x4xf32> -> vector<4x128xf32>
    %c0_18 = arith.constant 0 : index
    %c0_19 = arith.constant 0 : index
    %c0_20 = arith.constant 0 : index
    %53 = vector.load %arg3[%c0_18, %c0_19, %c0_20] : memref<1x4x128xf32, #tpu.memory_space<vmem>>, vector<1x4x128xf32>
    %54 = vector.shape_cast %53 : vector<1x4x128xf32> to vector<4x128xf32>
    %55 = arith.addf %52, %54 : vector<4x128xf32>
    %c0_21 = arith.constant 0 : index
    %c0_22 = arith.constant 0 : index
    %c0_23 = arith.constant 0 : index
    %56 = vector.load %arg8[%c0_21, %c0_22, %c0_23] : memref<1x4x128xf32, #tpu.memory_space<vmem>>, vector<1x4x128xf32>
    %57 = vector.shape_cast %56 : vector<1x4x128xf32> to vector<4x128xf32>
    %58 = vector.shape_cast %55 : vector<4x128xf32> to vector<1x4x128xf32>
    tpu.vector_store %arg8[%c0_21, %c0_22, %c0_23], %58 {strides = array<i32>} : memref<1x4x128xf32, #tpu.memory_space<vmem>>, vector<1x4x128xf32>,
    return
  }
  func.func @transform_0(%arg0: i32, %arg1: i32) -> (i32, i32, i32, i32, i32) {
    %c0_i32 = arith.constant 0 : i32
    %c0_i32_0 = arith.constant 0 : i32
    %c0_i32_1 = arith.constant 0 : i32
    %c0_i32_2 = arith.constant 0 : i32
    return %arg0, %arg1, %c0_i32, %c0_i32_0, %c0_i32_1 : i32, i32, i32, i32, i32
  }
  func.func @transform_1(%arg0: i32, %arg1: i32) -> (i32, i32, i32) {
    %c0_i32 = arith.constant 0 : i32
    %c0_i32_0 = arith.constant 0 : i32
    return %arg0, %c0_i32, %arg1 : i32, i32, i32
  }
  func.func @transform_2(%arg0: i32, %arg1: i32) -> (i32, i32) {
    %c0_i32 = arith.constant 0 : i32
    %c0_i32_0 = arith.constant 0 : i32
    %c0_i32_1 = arith.constant 0 : i32
    return %c0_i32, %c0_i32_0 : i32, i32
  }
  func.func @transform_3(%arg0: i32, %arg1: i32) -> (i32, i32) {
    %c0_i32 = arith.constant 0 : i32
    %c0_i32_0 = arith.constant 0 : i32
    %c0_i32_1 = arith.constant 0 : i32
    return %c0_i32, %c0_i32_0 : i32, i32
  }
  func.func @transform_4(%arg0: i32, %arg1: i32) -> (i32, i32) {
    %c0_i32 = arith.constant 0 : i32
    %c0_i32_0 = arith.constant 0 : i32
    %c0_i32_1 = arith.constant 0 : i32
    return %c0_i32, %c0_i32_0 : i32, i32
  }
  func.func @transform_5(%arg0: i32, %arg1: i32) -> (i32, i32) {
    %c0_i32 = arith.constant 0 : i32
    %c0_i32_0 = arith.constant 0 : i32
    %c0_i32_1 = arith.constant 0 : i32
    return %c0_i32, %c0_i32_0 : i32, i32
  }
  func.func @transform_6(%arg0: i32, %arg1: i32) -> (i32, i32, i32) {
    %c0_i32 = arith.constant 0 : i32
    %c0_i32_0 = arith.constant 0 : i32
    return %arg0, %c0_i32, %arg1 : i32, i32, i32
  }
}

</mosaic_0001>

<bundles_post_ra>
// kernel: tpu_custom_call.1
= control target key start
LH: loop header
LB: loop body
LE: loop exit
PB: predicated region body
PF: predicated region fallthrough
CT: control target
= control target key end

     0   :  { %s3356_s0 = inlined_call_operand.vmem [shape: bf16[2,2,12,18,4], index: 0, kind: input, shape index: {}]   ;;  %s3357_s1 = inlined_call_operand.vmem [shape: f32[2,4,256], index: 1, kind: input, shape index: {}]   ;;  %s3358_s2 = inlined_call_operand.vmem [shape: bf16[36,16], index: 2, kind: input, shape index: {}]   ;;  %s3359_s3 = inlined_call_operand.vmem [shape: f32[1,16], index: 3, kind: input, shape index: {}]   ;;  %s3360_s4 = inlined_call_operand.vmem [shape: bf16[144,4], index: 4, kind: input, shape index: {}]   ;;  %s3361_s5 = inlined_call_operand.vmem [shape: f32[1,4], index: 5, kind: input, shape index: {}]   ;;  %s3362_s6 = inlined_call_operand.hbm [shape: f32[2,4,256], index: 6, kind: output, shape index: {}]  }
   0x1   :  { %3374 = sst [smem:[#allocation6_spill]] %s3356_s0 }
   0x2   :  { %3375 = sst [smem:[#allocation7_spill]] %s3358_s2 }
   0x3   :  { %3376 = sst [smem:[#allocation8_spill]] %s3359_s3 }
   0x4   :  { %3377 = sst [smem:[#allocation9_spill]] %s3360_s4 }
   0x5   :  { %3378 = sst [smem:[#allocation10_spill]] %s3361_s5 }
   0x6   :  { %11 = vsyncpa [#allocation3], 0 }
   0x7   :  { %13 = vsyncpa [#allocation3 + $0x1], 0  ;;  %s2470_s21 = smov 0   ;;  %s2472_s22 = smov 0  }
   0x8   :  { %s2474_s23 = smov 0   ;;  %s2476_s24 = smov 0  }
   0x9   :  { %s2478_s25 = smov 0   ;;  %s2480_s26 = smov 0  }
   0xa   :  { %s2482_s27 = smov 0   ;;  %s2484_s28 = smov 0  }
   0xb LB: > { %s2073_s29 = sadd.s32 4294967295, %s2418_s28   ;;  %s2074_s30 = sadd.s32 4294967294, %s2418_s28   ;;  %s2418_s28 = sphi %s2484_s28, %s19_s28   ;;  %s2414_s27 = sphi %s2482_s27, %s3401_s27   ;;  %s2410_s26 = sphi %s2480_s26, %s3400_s26   ;;  %s2406_s25 = sphi %s2478_s25, %s3399_s25   ;;  %s2402_s24 = sphi %s2476_s24, %s3398_s24   ;;  %s2398_s23 = sphi %s2474_s23, %s3397_s23   ;;  %s2394_s22 = sphi %s2472_s22, %s3396_s22   ;;  %s2390_s21 = sphi %s2470_s21, %s3395_s21  }
   0xc   : > { %s28_s7 = sadd.s32 1, %s2410_s26  ;;  %s31_s8 = sadd.s32 1, %s2414_s27 }
   0xd   : > { %p29_p0 = scmp.ge.s32.totalorder %s28_s7, 2  ;;  %p190_p1 = scmp.ne.s32.totalorder %s2398_s23, %s2394_s22 }
   0xe   : > { %p191_p2 = scmp.eq.s32.totalorder %s2073_s29, 3  ;;  %p196_p5 = scmp.ne.s32.totalorder %s2394_s22, %s2390_s21 }
   0xf   : > { %s3403_s7 = smov (%p29_p0, %s28_s7), 0  ;;  %s3405_s8 = smov (!%p29_p0, %s31_s8), %s2414_s27 }
  0x10   : > { %s176_s9 = ssub.s32 %s2410_s26, %s3403_s7  ;;  %p2521_p3 = por %p191_p2, %p190_p1 }
  0x11   : > { %p33_p4 = scmp.ge.s32.totalorder %s3405_s8, 2  ;;  %p197_p6 = scmp.eq.s32.totalorder %s2074_s30, 3 }
  0x12   : > { %p2077_p7 = scmp.ge.s32.totalorder %s2418_s28, 1  ;;  %p250_p9 = scmp.lt.s32.totalorder %s2418_s28, 5 }
  0x13   : > { %s3407_s8 = smov (%p33_p4, %s3405_s8), 0  ;;  %p2530_p8 = por %p197_p6, %p196_p5 }
  0x14   : > { %3380 = sst [smem:[#allocation5_spill]] %s3407_s8  ;;  %s175_s12 = ssub.s32 %s2414_s27, %s3407_s8 }
  0x15   : > { %s180_s13 = sadd.s32 1, %s2398_s23  ;;  %s177_s14 = sor.u32 %s176_s9, %s175_s12 }
  0x16   : > { %p251_p10 = pnand %p2077_p7, %p250_p9  ;;  %p178_p11 = scmp.eq.s32.totalorder %s177_s14, 0 }
  0x17   : > { %p292_p12 = scmp.lt.s32.totalorder (!%p251_p10), %s2406_s25, 1  ;;  %p294_p13 = scmp.lt.s32.totalorder (!%p251_p10), %s2402_s24, 1  ;;  %vm567_vm0 = vcmask (!%p251_p10), 1046528   ;;  %vm426_vm1 = vsmask.f32 (!%p251_p10), 7424  ;;  %vm1000_vm2 = vcmask (!%p251_p10), 1041408  }
  0x18   : > { %s2539_s15 = scalar_select %p178_p11, %s2398_s23, %s180_s13  }
  0x19   : > { %254 = sbr.rel (%p251_p10) target bundleno = 990 (0x3de), region = 44  ;;  %s3382_s0 = sld [smem:[#allocation6_spill]] (!%p251_p10)  ;;  %vm784_vm3 = vcmask (!%p251_p10), 31744   ;;  %vm805_vm4 = vcmask (!%p251_p10), 64512   ;;  %vm826_vm5 = vcmask (!%p251_p10), 97280   ;;  %vm847_vm6 = vcmask (!%p251_p10), 130048  }
  0x1a   : > { %s3367_s13 = smov (!%p251_p10), 12   ;;  %s3363_s14 = smov (!%p251_p10), 20   ;;  %vm868_vm7 = vcmask (!%p251_p10), 162816   ;;  %vm889_vm8 = vcmask (!%p251_p10), 195584   ;;  %vm910_vm9 = vcmask (!%p251_p10), 228352   ;;  %vm931_vm10 = vcmask (!%p251_p10), 261120  }
  0x1b   : > { %s3383_s2 = sld [smem:[#allocation7_spill]] (!%p251_p10)  ;;  %s3369_s9 = smov (!%p251_p10), 24   ;;  %vm979_vm11 = vcmask (!%p251_p10), 293888  }
  0x1c   : > { %s3387_s30 = smov (!%p251_p10), 24   ;;  %p1137_p0 = scmp.eq.s32.totalorder (!%p251_p10), %s2402_s24, 0 }
  0x1d   : > { %p1139_p1 = scmp.eq.s32.totalorder (!%p251_p10), %s2402_s24, 1  ;;  %s3388_s3 = sld [smem:[#allocation8_spill]] (!%p251_p10) }
  0x1e   : > { %s3391_s4 = sld [smem:[#allocation9_spill]] (!%p251_p10)  ;;  %s3393_s5 = sld [smem:[#allocation10_spill]] (!%p251_p10) }
  0x20   : > { %s2544_s16 = scalar_select %p292_p12, %s2406_s25, 1 }
  0x21   : > { %s2547_s17 = scalar_select %p294_p13, %s2402_s24, 1  ;;  %v2308_v44 = vld [vmem:[%s3383_s2] sm:$0xff]   ;;  %v2310_v46 = vld [vmem:[%s3383_s2 + $0x8] sm:$0xff]   ;;  %v2312_v50 = vld [vmem:[%s3383_s2 + $0x10] ss:$0 sps:$4 sm:$0x33]  }
  0x22   : > { %s2202_s18 = smul.u32 72, %s2544_s16  ;;  %2156 = vmatprep.subr.bf16.mxu0 %v2308_v44  ;;  %v1002_v54 = vsel %vm1000_vm2, %v2312_v50, 0 }
  0x23   : > { %s2201_s19 = smul.u32 36, %s2547_s17  ;;  %2157 = vmatpush3.bf16.msra.mxu0 %v2308_v44 }
  0x24   : > { %2158 = vmatprep.subr.bf16.mxu0 %v2310_v46 }
  0x25   : > { %s298_s20 = sadd.s32 %s2202_s18, %s2201_s19  ;;  %s2422_s18 = smov 8  }
  0x26   : > { %s2079_s29 = sshll.u32 %s298_s20, 2  ;;  %s2423_s19 = smov 4  }
  0x27   : > { %s2554_s12 = scalar_lea.vmem %s3382_s0, %s2079_s29  ;;  %s3365_s20 = smov 16   ;;  %2159 = vmatpush3.bf16.msra.mxu0 %v2310_v46 }
  0x28   : > { %v2557_v0 = vld [vmem:[%s2554_s12 + $0x18] sm:$0xff]   ;;  %v2560_v1 = vld [vmem:[%s2554_s12 + $0xc] sm:$0xff]   ;;  %v2290_v2 = vld [vmem:[%s2554_s12 + $0x14] ss:$0 sps:$4 sm:$0x11]   ;;  %2200 = vmatprep.subr.msk.bf16.mxu0 %vm1000_vm2, %v2312_v50  ;;  %s3386_s29 = smov 20  }
  0x29   : > { %625 = vrot.lane.b32.xlu1 %v2557_v0, %s3367_s13  ;;  %v2566_v3 = vld [vmem:[%s2554_s12] sm:$0xff]   ;;  %623 = vrot.lane.b32.xlu0 %v2560_v1, %s3367_s13  ;;  %v571_v4 = vrot.slane %v2560_v1, 1  ;;  %v572_v5 = vrot.slane %v2290_v2, 1  ;;  %v2292_v6 = vld [vmem:[%s2554_s12 + $0x8] ss:$0 sps:$4 sm:$0x11]  }
  0x2a   : > { %v568_v7 = vrot.slane %v2566_v3, 1  ;;  %v428_v8 = vshrl.u32 %v2566_v3, 16  ;;  %v430_v9 = vshll.u32 %v2566_v3, 16  ;;  %v440_v10 = vshrl.u32 %v2560_v1, 16  ;;  %v2586_v30 = vld [vmem:[%s2554_s12 + $0x24] sm:$0xff]   ;;  %s2426_s13 = smov 28  }
  0x2b   : > { %v573_v11 = vsel %vm567_vm0, %v571_v4, %v572_v5  ;;  %v569_v12 = vrot.slane %v2292_v6, 1  ;;  %v435_v13 = vshll.u32 %v2292_v6, 16  ;;  %v2293_v14 = vld [vmem:[%s2554_s12 + $0x20] ss:$0 sps:$4 sm:$0x11]   ;;  %v442_v15 = vshll.u32 %v2560_v1, 16  ;;  %2161 = vmatpush3.bf16.msra.mxu0 %v1002_v54 }
  0x2c   : > { %v432_v16 = vrot.slane %v430_v9, 1  ;;  %v447_v17 = vshll.u32 %v2290_v2, 16  ;;  %v454_v18 = vshll.u32 %v2557_v0, 16  ;;  %v574_v23 = vrot.slane %v2557_v0, 1  ;;  %v2616_v49 = vld [vmem:[%s2554_s12 + $0x30] sm:$0xff]   ;;  %v2632_v60 = vld [vmem:[%s2554_s12 + $0x3c] sm:$0xff]  }
  0x2d   : > { %681 = vrot.lane.b32.xlu0 %v573_v11, %s3363_s14  ;;  %v570_v19 = vsel %vm567_vm0, %v568_v7, %v569_v12  ;;  %v437_v20 = vrot.slane %v435_v13, 1  ;;  %v444_v21 = vrot.slane %v442_v15, 1  ;;  %v452_v25 = vshrl.u32 %v2557_v0, 16  ;;  %v2295_v33 = vld [vmem:[%s2554_s12 + $0x2c] ss:$0 sps:$4 sm:$0x11]  }
  0x2e   : > { %598 = vrot.lane.b32.xlu1 %v570_v19, %s2422_s18  ;;  %v433_v22 = vor.u32 %v432_v16, %v428_v8  ;;  %v449_v24 = vrot.slane %v447_v17, 1  ;;  %v575_v26 = vrot.slane %v2293_v14, 1  ;;  %v456_v28 = vrot.slane %v454_v18, 1  ;;  %v2297_v52 = vld [vmem:[%s2554_s12 + $0x38] ss:$0 sps:$4 sm:$0x11]  }
  0x2f   : > { %v445_v27 = vor.u32 %v444_v21, %v440_v10  ;;  %v459_v29 = vshll.u32 %v2293_v14, 16  ;;  %v466_v37 = vshll.u32 %v2586_v30, 16  ;;  %v464_v39 = vshrl.u32 %v2586_v30, 16  ;;  %v2299_v2 = vld [vmem:[%s2554_s12 + $0x44] ss:$0 sps:$4 sm:$0x11]  }
  0x30   : > { %v438_v31 = vsel %vm426_vm1, %v433_v22, %v437_v20  ;;  %v576_v34 = vsel %vm567_vm0, %v574_v23, %v575_v26  ;;  %v457_v35 = vor.u32 %v456_v28, %v452_v25  ;;  %v471_v41 = vshll.u32 %v2295_v33, 16  ;;  %v2657_v14 = vld [vmem:[%s2554_s12 + $0x48] sm:$0xff]   ;;  %v2301_v16 = vld [vmem:[%s2554_s12 + $0x50] ss:$0 sps:$4 sm:$0x11]   ;;  %v2670_v23 = vld [vmem:[%s2554_s12 + $0x54] sm:$0xff]  }
  0x31   : > { %547 = vrot.lane.b32.xlu0 %v438_v31, %s2423_s19  ;;  %v450_v32 = vsel %vm426_vm1, %v445_v27, %v449_v24  ;;  %v461_v36 = vrot.slane %v459_v29, 1  ;;  %v468_v40 = vrot.slane %v466_v37, 1  ;;  %v577_v47 = vrot.slane %v2586_v30, 1  ;;  %v2303_v27 = vld [vmem:[%s2554_s12 + $0x5c] ss:$0 sps:$4 sm:$0x11]  }
  0x32   : > { %600 = vrot.lane.b32.xlu1 %v573_v11, %s2422_s18  ;;  %v473_v43 = vrot.slane %v471_v41, 1  ;;  %v578_v48 = vrot.slane %v2295_v33, 1  ;;  %v478_v53 = vshll.u32 %v2616_v49, 16  ;;  %v476_v55 = vshrl.u32 %v2616_v49, 16 }
  0x33   : > { %v462_v38 = vsel %vm426_vm1, %v457_v35, %v461_v36  ;;  %v469_v42 = vor.u32 %v468_v40, %v464_v39  ;;  %v483_v57 = vshll.u32 %v2297_v52, 16  ;;  %v580_v62 = vrot.slane %v2616_v49, 1  ;;  %v2696_v40 = vld [vmem:[%s2554_s12 + $0x60] sm:$0xff]   ;;  %v2305_v41 = vld [vmem:[%s2554_s12 + $0x68] ss:$0 sps:$4 sm:$0x11]  }
  0x34   : > { %v579_v51 = vsel %vm567_vm0, %v577_v47, %v578_v48  ;;  %v480_v56 = vrot.slane %v478_v53, 1  ;;  %v581_v63 = vrot.slane %v2297_v52, 1  ;;  %v490_v4 = vshll.u32 %v2632_v60, 16  ;;  %v2708_v48 = vld [vmem:[%s2554_s12 + $0x6c] sm:$0xff]  }
  0x35   : > { %549 = vrot.lane.b32.xlu0 %v450_v32, %s2423_s19  ;;  %v474_v45 = vsel %vm426_vm1, %v469_v42, %v473_v43  ;;  %v485_v59 = vrot.slane %v483_v57, 1  ;;  %v488_v6 = vshrl.u32 %v2632_v60, 16  ;;  %v495_v8 = vshll.u32 %v2299_v2, 16  ;;  %v2307_v53 = vld [vmem:[%s2554_s12 + $0x74] ss:$0 sps:$4 sm:$0x11]  }
  0x36   : > { %683 = vrot.lane.b32.xlu1 %v576_v34, %s3363_s14  ;;  %v481_v58 = vor.u32 %v480_v56, %v476_v55  ;;  %s3384_s14 = smov 12   ;;  %v582_v5 = vsel %vm567_vm0, %v580_v62, %v581_v63  ;;  %v492_v7 = vrot.slane %v490_v4, 1  ;;  %v583_v12 = vrot.slane %v2632_v60, 1 }
  0x37   : > { %v497_v10 = vrot.slane %v495_v8, 1  ;;  %v584_v13 = vrot.slane %v2299_v2, 1  ;;  %v502_v17 = vshll.u32 %v2657_v14, 16  ;;  %v500_v18 = vshrl.u32 %v2657_v14, 16 }
  0x38   : > { %v486_v61 = vsel %vm426_vm1, %v481_v58, %v485_v59  ;;  %v493_v9 = vor.u32 %v492_v7, %v488_v6  ;;  %v507_v20 = vshll.u32 %v2301_v16, 16  ;;  %v586_v25 = vrot.slane %v2657_v14, 1 }
  0x39   : > { %658 = vrot.lane.b32.xlu0 %v450_v32, %s3365_s20  ;;  %v585_v15 = vsel %vm567_vm0, %v583_v12, %v584_v13  ;;  %v504_v19 = vrot.slane %v502_v17, 1  ;;  %v587_v26 = vrot.slane %v2301_v16, 1  ;;  %v514_v28 = vshll.u32 %v2670_v23, 16  ;;  %v2311_v13 = vld [vmem:[%s2554_s12 + $0x80] ss:$0 sps:$4 sm:$0x11]  }
  0x3a   : > { %660 = vrot.lane.b32.xlu1 %v462_v38, %s3365_s20  ;;  %s3385_s20 = smov 16   ;;  %v498_v11 = vsel %vm426_vm1, %v493_v9, %v497_v10  ;;  %v509_v22 = vrot.slane %v507_v20, 1  ;;  %v512_v31 = vshrl.u32 %v2670_v23, 16  ;;  %v519_v33 = vshll.u32 %v2303_v27, 16  ;;  %v2736_v10 = vld [vmem:[%s2554_s12 + $0x78] sm:$0xff]  }
  0x3b   : > { %v505_v21 = vor.u32 %v504_v19, %v500_v18  ;;  %v588_v29 = vsel %vm567_vm0, %v586_v25, %v587_v26  ;;  %v516_v32 = vrot.slane %v514_v28, 1  ;;  %v589_v37 = vrot.slane %v2670_v23, 1  ;;  %v2313_v28 = vld [vmem:[%s2554_s12 + $0x84] sm:$0xff]  }
  0x3c   : > { %v521_v35 = vrot.slane %v519_v33, 1  ;;  %v526_v42 = vshll.u32 %v2696_v40, 16  ;;  %v524_v43 = vshrl.u32 %v2696_v40, 16  ;;  %v593_v52 = vrot.slane %v2305_v41, 1 }
  0x3d   : > { %706 = vrot.lane.b32.xlu0 %v2557_v0, %s3369_s9  ;;  %v510_v24 = vsel %vm426_vm1, %v505_v21, %v509_v22  ;;  %v538_v54 = vshll.u32 %v2708_v48, 16  ;;  %v536_v56 = vshrl.u32 %v2708_v48, 16  ;;  %v543_v58 = vshll.u32 %v2307_v53, 16 }
  0x3e   : > { %708 = vrot.lane.b32.xlu1 %v2586_v30, %s3369_s9  ;;  %s2427_s9 = smov 32   ;;  %v528_v44 = vrot.slane %v526_v42, 1  ;;  %v596_v6 = vrot.slane %v2307_v53, 1  ;;  %v647_v19 = vshrl.u32 %v2736_v10, 16  ;;  %v654_v21 = vshll.u32 %v2311_v13, 16 }
  0x3f   : > { %v540_v57 = vrot.slane %v538_v54, 1  ;;  %v545_v63 = vrot.slane %v543_v58, 1  ;;  %v678_v33 = vrot.slane %v2736_v10, 1 }
  0x40   : > { %v529_v46 = vor.u32 %v528_v44, %v524_v43 }
  0x41   : > { %741 = vrot.lane.b32.xlu0 %v462_v38, %s2426_s13  ;;  %v541_v62 = vor.u32 %v540_v57, %v536_v56 }
  0x42   : > { %743 = vrot.lane.b32.xlu1 %v474_v45, %s2426_s13 }
  0x43   : > { %v546_v4 = vsel %vm426_vm1, %v541_v62, %v545_v63 }
  0x45   : > { %764 = vrot.lane.b32.xlu0 %v576_v34, %s2427_s9 }
  0x46   : > { %551 = vrot.lane.b32.xlu1 %v462_v38, %s2423_s19  ;;  %v590_v38 = vrot.slane %v2303_v27, 1  ;;  %v656_v27 = vrot.slane %v654_v21, 1 }
  0x48   : > { %v591_v39 = vsel %vm567_vm0, %v589_v37, %v590_v38  ;;  %v2314_v38 = vld [vmem:[%s2554_s12 + $0x8c] ss:$0 sps:$4 sm:$0x11]   ;;  %s1138_s12 = scalar_select %p1137_p0, 0, 4294967295 }
  0x49   : > { %766 = vrot.lane.b32.xlu0 %v579_v51, %s2427_s9 }
  0x4a   : > { %553 = vrot.lane.b32.xlu1 %v474_v45, %s2423_s19 }
  0x4d   : > { %602 = vrot.lane.b32.xlu0 %v576_v34, %s2422_s18  ;;  %v517_v34 = vor.u32 %v516_v32, %v512_v31 }
  0x4e   : > { %604 = vrot.lane.b32.xlu1 %v579_v51, %s2422_s18 }
  0x4f   : > { %v522_v36 = vsel %vm426_vm1, %v517_v34, %v521_v35  ;;  %v679_v34 = vrot.slane %v2311_v13, 1 }
  0x51   : > { %627 = vrot.lane.b32.xlu0 %v2586_v30, %s3384_s14 }
  0x52   : > { %629 = vrot.lane.b32.xlu1 %v2616_v49, %s3384_s14 }
  0x55   : > { %662 = vrot.lane.b32.xlu0 %v474_v45, %s3385_s20  ;;  %v531_v45 = vshll.u32 %v2305_v41, 16 }
  0x56   : > { %664 = vrot.lane.b32.xlu1 %v486_v61, %s3385_s20 }
  0x57   : > { %v533_v47 = vrot.slane %v531_v45, 1  ;;  %v680_v45 = vsel %vm567_vm0, %v678_v33, %v679_v34 }
  0x59   : > { %685 = vrot.lane.b32.xlu0 %v579_v51, %s3386_s29  ;;  %v534_v50 = vsel %vm426_vm1, %v529_v46, %v533_v47  ;;  %v592_v51 = vrot.slane %v2696_v40, 1 }
  0x5a   : > { %687 = vrot.lane.b32.xlu1 %v582_v5, %s3386_s29 }
  0x5b   : > { %v594_v55 = vsel %vm567_vm0, %v592_v51, %v593_v52  ;;  %v737_v52 = vshll.u32 %v2314_v38, 16 }
  0x5d   : > { %710 = vrot.lane.b32.xlu0 %v2616_v49, %s3387_s30 }
  0x5e   : > { %712 = vrot.lane.b32.xlu1 %v2632_v60, %s3387_s30 }
  0x61   : > { %745 = vrot.lane.b32.xlu0 %v486_v61, %s2426_s13 }
  0x62   : > { %747 = vrot.lane.b32.xlu1 %v498_v11, %s2426_s13 }
  0x65   : > { %768 = vrot.lane.b32.xlu0 %v582_v5, %s2427_s9 }
  0x66   : > { %555 = vrot.lane.b32.xlu1 %v486_v61, %s2423_s19 }
  0x69   : > { %770 = vrot.lane.b32.xlu0 %v585_v15, %s2427_s9 }
  0x6a   : > { %557 = vrot.lane.b32.xlu1 %v498_v11, %s2423_s19 }
  0x6d   : > { %606 = vrot.lane.b32.xlu0 %v582_v5, %s2422_s18  ;;  %v595_v5 = vrot.slane %v2708_v48, 1 }
  0x6e   : > { %608 = vrot.lane.b32.xlu1 %v585_v15, %s2422_s18 }
  0x6f   : > { %v2733_v9 = vsel %vm567_vm0, %v595_v5, %v596_v6  ;;  %v761_v5 = vrot.slane %v2313_v28, 1  ;;  %v762_v6 = vrot.slane %v2314_v38, 1 }
  0x71   : > { %631 = vrot.lane.b32.xlu0 %v2632_v60, %s3384_s14 }
  0x72   : > { %633 = vrot.lane.b32.xlu1 %v2657_v14, %s3384_s14 }
  0x75   : > { %666 = vrot.lane.b32.xlu0 %v498_v11, %s3385_s20 }
  0x76   : > { %668 = vrot.lane.b32.xlu1 %v510_v24, %s3385_s20 }
  0x79   : > { %689 = vrot.lane.b32.xlu0 %v585_v15, %s3386_s29  ;;  %v649_v15 = vshll.u32 %v2736_v10, 16 }
  0x7a   : > { %691 = vrot.lane.b32.xlu1 %v588_v29, %s3386_s29 }
  0x7b   : > { %v651_v20 = vrot.slane %v649_v15, 1 }
  0x7d   : > { %714 = vrot.lane.b32.xlu0 %v2657_v14, %s3387_s30 }
  0x7e   : > { %716 = vrot.lane.b32.xlu1 %v2670_v23, %s3387_s30 }
  0x81   : > { %749 = vrot.lane.b32.xlu0 %v510_v24, %s2426_s13 }
  0x82   : > { %751 = vrot.lane.b32.xlu1 %v522_v36, %s2426_s13 }
  0x85   : > { %772 = vrot.lane.b32.xlu0 %v588_v29, %s2427_s9 }
  0x86   : > { %774 = vrot.lane.b32.xlu1 %v591_v39, %s2427_s9 }
  0x89   : > { %559 = vrot.lane.b32.xlu0 %v510_v24, %s2423_s19 }
  0x8a   : > { %561 = vrot.lane.b32.xlu1 %v522_v36, %s2423_s19 }
  0x8d   : > { %610 = vrot.lane.b32.xlu0 %v588_v29, %s2422_s18 }
  0x8e   : > { %612 = vrot.lane.b32.xlu1 %v591_v39, %s2422_s18 }
  0x91   : > { %635 = vrot.lane.b32.xlu0 %v2670_v23, %s3384_s14 }
  0x92   : > { %637 = vrot.lane.b32.xlu1 %v2696_v40, %s3384_s14 }
  0x95   : > { %670 = vrot.lane.b32.xlu0 %v522_v36, %s3385_s20 }
  0x96   : > { %672 = vrot.lane.b32.xlu1 %v534_v50, %s3385_s20 }
  0x99   : > { %693 = vrot.lane.b32.xlu0 %v591_v39, %s3386_s29  ;;  %v732_v39 = vshll.u32 %v2313_v28, 16 }
  0x9a   : > { %695 = vrot.lane.b32.xlu1 %v594_v55, %s3386_s29 }
  0x9b   : > { %v626_v59 = vpop.permute.xlu1 %625  ;;  %v624_v61 = vpop.permute.xlu0 %623  ;;  %v734_v51 = vrot.slane %v732_v39, 1 }
  0x9d   : > { %718 = vrot.lane.b32.xlu0 %v2696_v40, %s3387_s30 }
  0x9e   : > { %720 = vrot.lane.b32.xlu1 %v2708_v48, %s3387_s30 }
  0x9f   : > { %v682_v2 = vpop.permute.xlu0 %681 }
  0xa0   : > { %v599_v7 = vpop.permute.xlu1 %598 }
  0xa1   : > { %753 = vrot.lane.b32.xlu0 %v534_v50, %s2426_s13 }
  0xa2   : > { %755 = vrot.lane.b32.xlu1 %v546_v4, %s2426_s13 }
  0xa3   : > { %v548_v8 = vpop.permute.xlu0 %547 }
  0xa4   : > { %v601_v11 = vpop.permute.xlu1 %600  ;;  %v786_v17 = vsel %vm784_vm3, %v2566_v3, %v548_v8  ;;  %v652_v3 = vor.u32 %v651_v20, %v647_v19 }
  0xa5   : > { %776 = vrot.lane.b32.xlu0 %v594_v55, %s2427_s9  ;;  %v807_v25 = vsel %vm805_vm4, %v786_v17, %v599_v7 }
  0xa6   : > { %778 = vrot.lane.b32.xlu1 %v2733_v9, %s2427_s9  ;;  %v828_v32 = vsel %vm826_vm5, %v807_v25, %v624_v61  ;;  %v657_v37 = vsel %vm426_vm1, %v652_v3, %v656_v27  ;;  %v739_v61 = vrot.slane %v737_v52, 1 }
  0xa7   : > { %v550_v12 = vpop.permute.xlu0 %549 }
  0xa8   : > { %v684_v16 = vpop.permute.xlu1 %683  ;;  %v788_v24 = vsel %vm784_vm3, %v2560_v1, %v550_v12 }
  0xa9   : > { %563 = vrot.lane.b32.xlu0 %v534_v50, %s2423_s19  ;;  %v809_v29 = vsel %vm805_vm4, %v788_v24, %v601_v11  ;;  %v730_v50 = vshrl.u32 %v2313_v28, 16 }
  0xaa   : > { %565 = vrot.lane.b32.xlu1 %v546_v4, %s2423_s19  ;;  %v830_v35 = vsel %vm826_vm5, %v809_v29, %v626_v59  ;;  %s3392_s19 = smov 64  }
  0xab   : > { %v659_v18 = vpop.permute.xlu0 %658  ;;  %v735_v59 = vor.u32 %v734_v51, %v730_v50 }
  0xac   : > { %v661_v22 = vpop.permute.xlu1 %660  ;;  %v849_v1 = vsel %vm847_vm6, %v828_v32, %v659_v18 }
  0xad   : > { %614 = vrot.lane.b32.xlu0 %v594_v55, %s2422_s18  ;;  %v870_v42 = vsel %vm868_vm7, %v849_v1, %v682_v2  ;;  %v851_v43 = vsel %vm847_vm6, %v830_v35, %v661_v22 }
  0xae   : > { %616 = vrot.lane.b32.xlu1 %v2733_v9, %s2422_s18  ;;  %v872_v55 = vsel %vm868_vm7, %v851_v43, %v684_v16 }
  0xaf   : > { %v707_v26 = vpop.permute.xlu0 %706 }
  0xb0   : > { %v709_v31 = vpop.permute.xlu1 %708  ;;  %v891_v44 = vsel %vm889_vm8, %v870_v42, %v707_v26 }
  0xb1   : > { %639 = vrot.lane.b32.xlu0 %v2708_v48, %s3384_s14  ;;  %v893_v56 = vsel %vm889_vm8, %v872_v55, %v709_v31 }
  0xb2   : > { %641 = vrot.lane.b32.xlu1 %v2736_v10, %s3384_s14  ;;  %s2428_s14 = smov 48  }
  0xb3   : > { %v742_v36 = vpop.permute.xlu0 %741 }
  0xb4   : > { %v744_v41 = vpop.permute.xlu1 %743  ;;  %v912_v46 = vsel %vm910_vm9, %v891_v44, %v742_v36 }
  0xb5   : > { %674 = vrot.lane.b32.xlu0 %v546_v4, %s3385_s20  ;;  %v914_v57 = vsel %vm910_vm9, %v893_v56, %v744_v41  ;;  %v740_v4 = vsel %vm426_vm1, %v735_v59, %v739_v61 }
  0xb6   : > { %676 = vrot.lane.b32.xlu1 %v657_v37, %s3385_s20 }
  0xb7   : > { %v765_v47 = vpop.permute.xlu0 %764 }
  0xb8   : > { %v552_v53 = vpop.permute.xlu1 %551  ;;  %v933_v54 = vsel %vm931_vm10, %v912_v46, %v765_v47 }
  0xb9   : > { %697 = vrot.lane.b32.xlu0 %v2733_v9, %s3386_s29  ;;  %2162 = vmatprep.mubr.msk.bf16.mxu0 %vm979_vm11, %v933_v54  ;;  %v763_v9 = vsel %vm567_vm0, %v761_v5, %v762_v6  ;;  %v790_v18 = vsel %vm784_vm3, %v2557_v0, %v552_v53 }
  0xba   : > { %699 = vrot.lane.b32.xlu1 %v680_v45, %s3386_s29  ;;  %s2429_s29 = smov 80  }
  0xbb   : > { %v767_v58 = vpop.permute.xlu0 %766 }
  0xbc   : > { %v554_v62 = vpop.permute.xlu1 %553  ;;  %v935_v63 = vsel %vm931_vm10, %v914_v57, %v767_v58 }
  0xbd   : > { %722 = vrot.lane.b32.xlu0 %v2736_v10, %s3387_s30  ;;  %2163 = vmatmul.mubr.msk.bf16.vlgmr.msra.gmra.mrb[0].mxu0 %vm979_vm11, %v935_v63  ;;  %v792_v25 = vsel %vm784_vm3, %v2586_v30, %v554_v62 }
  0xbe   : > { %724 = vrot.lane.b32.xlu1 %v2313_v28, %s3387_s30  ;;  %s3371_s30 = smov 64  }
  0xbf   : > { %v603_v2 = vpop.permute.xlu0 %602 }
  0xc0   : > { %v605_v7 = vpop.permute.xlu1 %604  ;;  %v811_v19 = vsel %vm805_vm4, %v790_v18, %v603_v2 }
  0xc1   : > { %757 = vrot.lane.b32.xlu0 %v657_v37, %s2426_s13  ;;  %v813_v3 = vsel %vm805_vm4, %v792_v25, %v605_v7 }
  0xc2   : > { %759 = vrot.lane.b32.xlu1 %v740_v4, %s2426_s13  ;;  %s1140_s13 = scalar_select %p1139_p1, 9, 4294967295 }
  0xc3   : > { %v628_v8 = vpop.permute.xlu0 %627 }
  0xc4   : > { %v630_v11 = vpop.permute.xlu1 %629  ;;  %v832_v20 = vsel %vm826_vm5, %v811_v19, %v628_v8 }
  0xc5   : > { %780 = vrot.lane.b32.xlu0 %v680_v45, %s2427_s9  ;;  %v834_v28 = vsel %vm826_vm5, %v813_v3, %v630_v11 }
  0xc6   : > { %782 = vrot.lane.b32.xlu1 %v763_v9, %s2427_s9 }
  0xc7   : > { %v663_v10 = vpop.permute.xlu0 %662 }
  0xc8   : > { %v665_v12 = vpop.permute.xlu1 %664  ;;  %v853_v22 = vsel %vm847_vm6, %v832_v20, %v663_v10 }
  0xc9   : > { %v855_v31 = vsel %vm847_vm6, %v834_v28, %v665_v12 }
  0xcb   : > { %v686_v13 = vpop.permute.xlu0 %685 }
  0xcc   : > { %v688_v15 = vpop.permute.xlu1 %687  ;;  %v874_v26 = vsel %vm868_vm7, %v853_v22, %v686_v13 }
  0xcd   : > { %v876_v33 = vsel %vm868_vm7, %v855_v31, %v688_v15 }
  0xcf   : > { %v711_v16 = vpop.permute.xlu0 %710 }
  0xd0   : > { %v713_v17 = vpop.permute.xlu1 %712  ;;  %v895_v27 = vsel %vm889_vm8, %v874_v26, %v711_v16 }
  0xd1   : > { %v897_v30 = vsel %vm889_vm8, %v876_v33, %v713_v17 }
  0xd3   : > { %v746_v21 = vpop.permute.xlu0 %745 }
  0xd4   : > { %v748_v24 = vpop.permute.xlu1 %747  ;;  %v916_v0 = vsel %vm910_vm9, %v895_v27, %v746_v21 }
  0xd5   : > { %v918_v34 = vsel %vm910_vm9, %v897_v30, %v748_v24 }
  0xd7   : > { %v769_v29 = vpop.permute.xlu0 %768 }
  0xd8   : > { %v556_v32 = vpop.permute.xlu1 %555  ;;  %v937_v1 = vsel %vm931_vm10, %v916_v0, %v769_v29 }
  0xd9   : > { %2166 = vmatprep.mubr.msk.bf16.mxu0 %vm979_vm11, %v937_v1  ;;  %v794_v51 = vsel %vm784_vm3, %v2616_v49, %v556_v32 }
  0xdb   : > { %v771_v35 = vpop.permute.xlu0 %770 }
  0xdc   : > { %v558_v36 = vpop.permute.xlu1 %557  ;;  %v939_v37 = vsel %vm931_vm10, %v918_v34, %v771_v35 }
  0xdd   : > { %2167 = vmatmul.mubr.msk.bf16.gmra.mrb[4].mxu0 %vm979_vm11, %v939_v37  ;;  %v796_v52 = vsel %vm784_vm3, %v2632_v60, %v558_v36 }
  0xdf   : > { %v607_v38 = vpop.permute.xlu0 %606 }
  0xe0   : > { %v609_v39 = vpop.permute.xlu1 %608  ;;  %v815_v53 = vsel %vm805_vm4, %v794_v51, %v607_v38 }
  0xe1   : > { %v817_v54 = vsel %vm805_vm4, %v796_v52, %v609_v39 }
  0xe3   : > { %v632_v41 = vpop.permute.xlu0 %631 }
  0xe4   : > { %v634_v42 = vpop.permute.xlu1 %633  ;;  %v836_v55 = vsel %vm826_vm5, %v815_v53, %v632_v41 }
  0xe5   : > { %v838_v57 = vsel %vm826_vm5, %v817_v54, %v634_v42 }
  0xe7   : > { %v667_v43 = vpop.permute.xlu0 %666 }
  0xe8   : > { %v669_v44 = vpop.permute.xlu1 %668  ;;  %v857_v58 = vsel %vm847_vm6, %v836_v55, %v667_v43 }
  0xe9   : > { %v859_v61 = vsel %vm847_vm6, %v838_v57, %v669_v44 }
  0xeb   : > { %v690_v45 = vpop.permute.xlu0 %689 }
  0xec   : > { %v692_v46 = vpop.permute.xlu1 %691  ;;  %v878_v62 = vsel %vm868_vm7, %v857_v58, %v690_v45 }
  0xed   : > { %v880_v49 = vsel %vm868_vm7, %v859_v61, %v692_v46 }
  0xef   : > { %v715_v47 = vpop.permute.xlu0 %714 }
  0xf0   : > { %v717_v50 = vpop.permute.xlu1 %716  ;;  %v899_v60 = vsel %vm889_vm8, %v878_v62, %v715_v47 }
  0xf1   : > { %v901_v63 = vsel %vm889_vm8, %v880_v49, %v717_v50 }
  0xf3   : > { %v750_v56 = vpop.permute.xlu0 %749 }
  0xf4   : > { %v752_v59 = vpop.permute.xlu1 %751  ;;  %v920_v2 = vsel %vm910_vm9, %v899_v60, %v750_v56 }
  0xf5   : > { %v922_v5 = vsel %vm910_vm9, %v901_v63, %v752_v59 }
  0xf7   : > { %v773_v4 = vpop.permute.xlu0 %772 }
  0xf8   : > { %v775_v6 = vpop.permute.xlu1 %774  ;;  %v941_v7 = vsel %vm931_vm10, %v920_v2, %v773_v4 }
  0xf9   : > { %v943_v8 = vsel %vm931_vm10, %v922_v5, %v775_v6  ;;  %2170 = vmatprep.mubr.msk.bf16.mxu0 %vm979_vm11, %v941_v7 }
  0xfa   : > { %2171 = vmatmul.mubr.msk.bf16.gmra.mrb[8].mxu0 %vm979_vm11, %v943_v8 }
  0xfb   : > { %v560_v9 = vpop.permute.xlu0 %559 }
  0xfc   : > { %v562_v11 = vpop.permute.xlu1 %561  ;;  %v798_v18 = vsel %vm784_vm3, %v2657_v14, %v560_v9  ;;  %v2877_v9 = vld [vmem:[%s3388_s3] ss:$0 sm:$0xff] }
  0xfd   : > { %v800_v19 = vsel %vm784_vm3, %v2670_v23, %v562_v11  ;;  %v2879_v11 = vstv %s1138_s12  ;;  %s2432_s12 = smov 96  }
  0xfe   : > { %vm1143_vm12 = vcmp.eq.s32.totalorder %v2879_v11, 1  ;;  %vm1142_vm14 = vcmp.eq.s32.totalorder %v2879_v11, 0 }
  0xff   : > { %v611_v10 = vpop.permute.xlu0 %610 }
 0x100   : > { %v613_v12 = vpop.permute.xlu1 %612  ;;  %v819_v21 = vsel %vm805_vm4, %v798_v18, %v611_v10  ;;  %v2881_v10 = vstv %s1140_s13 }
 0x101   : > { %v821_v24 = vsel %vm805_vm4, %v800_v19, %v613_v12  ;;  %vm1154_vm13 = vcmp.eq.s32.totalorder %v2881_v10, 1  ;;  %vm1153_vm15 = vcmp.eq.s32.totalorder %v2881_v10, 0 }
 0x102   : > { %vm1164_vm2 = vmor %vm1143_vm12, %vm1154_vm13  ;;  %vm1155_vm12 = vcmp.eq.s32.totalorder %v2881_v10, 2 }
 0x103   : > { %v636_v13 = vpop.permute.xlu0 %635 }
 0x104   : > { %v638_v15 = vpop.permute.xlu1 %637  ;;  %v840_v25 = vsel %vm826_vm5, %v819_v21, %v636_v13 }
 0x105   : > { %v842_v3 = vsel %vm826_vm5, %v821_v24, %v638_v15 }
 0x107   : > { %v671_v16 = vpop.permute.xlu0 %670 }
 0x108   : > { %v673_v17 = vpop.permute.xlu1 %672  ;;  %v861_v28 = vsel %vm847_vm6, %v840_v25, %v671_v16 }
 0x109   : > { %v863_v0 = vsel %vm847_vm6, %v842_v3, %v673_v17 }
 0x10b   : > { %v694_v20 = vpop.permute.xlu0 %693 }
 0x10c   : > { %v696_v22 = vpop.permute.xlu1 %695  ;;  %v882_v23 = vsel %vm868_vm7, %v861_v28, %v694_v20 }
 0x10d   : > { %v884_v31 = vsel %vm868_vm7, %v863_v0, %v696_v22 }
 0x10f   : > { %v719_v26 = vpop.permute.xlu0 %718 }
 0x110   : > { %v721_v27 = vpop.permute.xlu1 %720  ;;  %v903_v32 = vsel %vm889_vm8, %v882_v23, %v719_v26 }
 0x111   : > { %v905_v1 = vsel %vm889_vm8, %v884_v31, %v721_v27 }
 0x113   : > { %v754_v14 = vpop.permute.xlu0 %753 }
 0x114   : > { %v756_v29 = vpop.permute.xlu1 %755  ;;  %v924_v33 = vsel %vm910_vm9, %v903_v32, %v754_v14 }
 0x115   : > { %v926_v34 = vsel %vm910_vm9, %v905_v1, %v756_v29 }
 0x117   : > { %v777_v30 = vpop.permute.xlu0 %776 }
 0x118   : > { %v779_v35 = vpop.permute.xlu1 %778  ;;  %v945_v36 = vsel %vm931_vm10, %v924_v33, %v777_v30 }
 0x119   : > { %v947_v37 = vsel %vm931_vm10, %v926_v34, %v779_v35  ;;  %2174 = vmatprep.mubr.msk.bf16.mxu0 %vm979_vm11, %v945_v36 }
 0x11a   : > { %2175 = vmatmul.mubr.msk.bf16.gmra.mrb[12].mxu0 %vm979_vm11, %v947_v37 }
 0x11b   : > { %v564_v38 = vpop.permute.xlu0 %563 }
 0x11c   : > { %v566_v39 = vpop.permute.xlu1 %565  ;;  %v802_v47 = vsel %vm784_vm3, %v2696_v40, %v564_v38 }
 0x11d   : > { %v804_v50 = vsel %vm784_vm3, %v2708_v48, %v566_v39  ;;  %vm1163_vm3 = vmor %vm1142_vm14, %vm1153_vm15  ;;  %vm1147_vm15 = vcmp.eq.s32.totalorder %v2879_v11, 5 }
 0x11f   : > { %v615_v41 = vpop.permute.xlu0 %614 }
 0x120   : > { %v617_v42 = vpop.permute.xlu1 %616  ;;  %v823_v52 = vsel %vm805_vm4, %v802_v47, %v615_v41 }
 0x121   : > { %v825_v54 = vsel %vm805_vm4, %v804_v50, %v617_v42  ;;  %vm1293_vm4 = vcmask 1040384  }
 0x123   : > { %v640_v43 = vpop.permute.xlu0 %639 }
 0x124   : > { %v642_v44 = vpop.permute.xlu1 %641  ;;  %v844_v55 = vsel %vm826_vm5, %v823_v52, %v640_v43 }
 0x125   : > { %v846_v57 = vsel %vm826_vm5, %v825_v54, %v642_v44  ;;  %vm1294_vm5 = vsmask.f32 256 }
 0x127   : > { %v675_v45 = vpop.permute.xlu0 %674 }
 0x128   : > { %v677_v46 = vpop.permute.xlu1 %676  ;;  %v865_v59 = vsel %vm847_vm6, %v844_v55, %v675_v45 }
 0x129   : > { %v867_v40 = vsel %vm847_vm6, %v846_v57, %v677_v46 }
 0x12b   : > { %v698_v51 = vpop.permute.xlu0 %697 }
 0x12c   : > { %v700_v53 = vpop.permute.xlu1 %699  ;;  %v886_v62 = vsel %vm868_vm7, %v865_v59, %v698_v51 }
 0x12d   : > { %v888_v49 = vsel %vm868_vm7, %v867_v40, %v700_v53  ;;  %vm2891_vm7 = vmand %vm1293_vm4, %vm1294_vm5  ;;  %vm1157_vm4 = vcmp.eq.s32.totalorder %v2881_v10, 4 }
 0x12f   : > { %v723_v56 = vpop.permute.xlu0 %722 }
 0x130   : > { %v725_v58 = vpop.permute.xlu1 %724  ;;  %v907_v60 = vsel %vm889_vm8, %v886_v62, %v723_v56 }
 0x131   : > { %v909_v63 = vsel %vm889_vm8, %v888_v49, %v725_v58  ;;  %vm1145_vm8 = vcmp.eq.s32.totalorder %v2879_v11, 3 }
 0x133   : > { %v758_v61 = vpop.permute.xlu0 %757 }
 0x134   : > { %v760_v48 = vpop.permute.xlu1 %759  ;;  %v928_v2 = vsel %vm910_vm9, %v907_v60, %v758_v61 }
 0x135   : > { %v930_v5 = vsel %vm910_vm9, %v909_v63, %v760_v48  ;;  %vm1156_vm9 = vcmp.eq.s32.totalorder %v2881_v10, 3 }
 0x136   : > { %vm1166_vm13 = vmor %vm1145_vm8, %vm1156_vm9  ;;  %vm1149_vm9 = vcmp.eq.s32.totalorder %v2879_v11, 7 }
 0x137   : > { %v781_v4 = vpop.permute.xlu0 %780 }
 0x138   : > { %v783_v6 = vpop.permute.xlu1 %782  ;;  %v949_v7 = vsel %vm931_vm10, %v928_v2, %v781_v4 }
 0x139   : > { %v951_v8 = vsel %vm931_vm10, %v930_v5, %v783_v6  ;;  %2178 = vmatprep.mubr.msk.bf16.mxu0 %vm979_vm11, %v949_v7  ;;  %v2315_v7 = vld [vmem:[%s3391_s4] sm:$0xff]  }
 0x13a   : > { %2179 = vmatmul.mubr.msk.bf16.gmra.mrb[16].mxu0 %vm979_vm11, %v951_v8  ;;  %vm1144_vm11 = vcmp.eq.s32.totalorder %v2879_v11, 2 }
 0x13b   : > { %vm1165_vm14 = vmor %vm1144_vm11, %vm1155_vm12  ;;  %vm1160_vm11 = vcmp.eq.s32.totalorder %v2881_v10, 7  ;;  %vm1148_vm12 = vcmp.eq.s32.totalorder %v2879_v11, 6 }
 0x190   : > { %v2164_v12 = vpop.f32.mrb[0].mxu0 }
 0x191   : > { %v1047_v13 = vadd.f32 %v2164_v12, %v2877_v9  ;;  %v1038_v15 = vpop.f32.mrb[1].mxu0 }
 0x192   : > { %v1039_v16 = vadd.f32 %v2877_v9, %v1038_v15  ;;  %v2165_v17 = vpop.f32.mrb[2].mxu0 }
 0x193   : > { %v1119_v18 = vmax.f32 %v1047_v13, 0.0  ;;  %v1050_v19 = vadd.f32 %v2165_v17, %v2877_v9  ;;  %v1041_v20 = vpop.f32.mrb[3].mxu0  ;;  %v2431_v13 = vmov 0  }
 0x194   : > { %v1117_v21 = vmax.f32 %v1039_v16, 0.0  ;;  %v1042_v22 = vadd.f32 %v2877_v9, %v1041_v20  ;;  %1826 = vmatprep.subr.bf16.mxu0 %v2431_v13  ;;  %2182 = vmatprep.subr.bf16.mxu1 %v2431_v13 }
 0x195   : > { %v1120_v24 = vmax.f32 %v1050_v19, 0.0  ;;  %v1175_v26 = vsel %vm1164_vm2, 0.0, %v1119_v18  ;;  %1827 = vmatpush1.bf16.msra.mxu0 %v2315_v7  ;;  %2191 = vmatpush1.bf16.msra.mxu1 %v2315_v7  ;;  %v2316_v19 = vld [vmem:[%s3391_s4 + $0x8] sm:$0xff]   ;;  %v2323_v7 = vld [vmem:[%s3391_s4 + $0x40] sm:$0xff]  }
 0x196   : > { %v1118_v25 = vmax.f32 %v1042_v22, 0.0  ;;  %v1173_v27 = vsel %vm1163_vm3, 0.0, %v1117_v21  ;;  %1828 = vmatprep.subr.bf16.mxu0 %v2431_v13  ;;  %2183 = vmatprep.subr.bf16.mxu1 %v2431_v13 }
 0x197   : > { %v1176_v3 = vsel %vm1164_vm2, 0.0, %v1120_v24  ;;  %vm1158_vm2 = vcmp.eq.s32.totalorder %v2881_v10, 5 }
 0x198   : > { %v1194_v28 = vpack.c.bf16 %v1176_v3, %v1175_v26  ;;  %v1174_v0 = vsel %vm1163_vm3, 0.0, %v1118_v25  ;;  %vm1146_vm3 = vcmp.eq.s32.totalorder %v2879_v11, 4  ;;  %vm1168_vm5 = vmor %vm1147_vm15, %vm1158_vm2  ;;  %vm1151_vm2 = vcmp.eq.s32.totalorder %v2879_v11, 9 }
 0x199   : > { %v1193_v14 = vpack.c.bf16 %v1174_v0, %v1173_v27  ;;  %1829 = vmatpush1.bf16.msra.mxu0 %v2316_v19  ;;  %2192 = vmatpush1.bf16.msra.mxu1 %v2316_v19  ;;  %vm1167_vm8 = vmor %vm1146_vm3, %vm1157_vm4  ;;  %vm1162_vm3 = vcmp.eq.s32.totalorder %v2881_v10, 9  ;;  %vm1150_vm4 = vcmp.eq.s32.totalorder %v2879_v11, 8 }
 0x19a   : > { %v1211_v29 = vshrl.u32 %v1194_v28, 16  ;;  %v1214_v1 = vshll.u32 %v1194_v28, 16  ;;  %1830 = vmatprep.subr.bf16.mxu0 %v2431_v13  ;;  %2184 = vmatprep.subr.bf16.mxu1 %v2431_v13  ;;  %v2317_v28 = vld [vmem:[%s3391_s4 + $0x10] sm:$0xff]  }
 0x19b   : > { %v1204_v23 = vshrl.u32 %v1193_v14, 16  ;;  %v1207_v30 = vshll.u32 %v1193_v14, 16 }
 0x19c   : > { %v1213_v32 = vrot.slane %v1211_v29, 7 }
 0x19d   : > { %v1206_v33 = vrot.slane %v1204_v23, 7  ;;  %1831 = vmatpush1.bf16.msra.mxu0 %v2317_v28  ;;  %2193 = vmatpush1.bf16.msra.mxu1 %v2317_v28 }
 0x19e   : > { %v1216_v34 = vor.u32 %v1214_v1, %v1213_v32  ;;  %v1307_v35 = vsel %vm2891_vm7, %v1213_v32, 0  ;;  %1832 = vmatprep.subr.bf16.mxu0 %v2431_v13  ;;  %2185 = vmatprep.subr.bf16.mxu1 %v2431_v13 }
 0x19f   : > { %v1209_v36 = vor.u32 %v1207_v30, %v1206_v33  ;;  %v1306_v37 = vsel %vm2891_vm7, %v1206_v33, 0  ;;  %v1448_v42 = vrot.slane %v1307_v35, 1  ;;  %v1336_v58 = vshll.u32 %v1307_v35, 16 }
 0x1a0   : > { %v2901_v38 = vsel %vm2891_vm7, 0, %v1216_v34  ;;  %v1324_v44 = vshll.u32 %v1306_v37, 16  ;;  %v1445_v56 = vrot.slane %v1306_v37, 1  ;;  %v2318_v34 = vld [vmem:[%s3391_s4 + $0x18] sm:$0xff]  }
 0x1a1   : > { %v2905_v39 = vsel %vm2891_vm7, 0, %v1209_v36  ;;  %1485 = vrot.lane.b32.xlu0 %v2901_v38, %s2428_s14  ;;  %v1447_v41 = vrot.slane %v2901_v38, 1  ;;  %v1331_v46 = vshll.u32 %v2901_v38, 16  ;;  %v1329_v57 = vshrl.u32 %v2901_v38, 16  ;;  %1833 = vmatpush1.bf16.msra.mxu0 %v2318_v34 }
 0x1a2   : > { %v1319_v43 = vshll.u32 %v2905_v39, 16  ;;  %v1317_v47 = vshrl.u32 %v2905_v39, 16  ;;  %v1326_v52 = vrot.slane %v1324_v44, 1  ;;  %v1444_v53 = vrot.slane %v2905_v39, 1  ;;  %2194 = vmatpush1.bf16.msra.mxu1 %v2318_v34  ;;  %1834 = vmatprep.subr.bf16.mxu0 %v2431_v13 }
 0x1a3   : > { %v1449_v45 = vsel %vm567_vm0, %v1447_v41, %v1448_v42  ;;  %v1333_v54 = vrot.slane %v1331_v46, 1  ;;  %v1338_v61 = vrot.slane %v1336_v58, 1  ;;  %2186 = vmatprep.subr.bf16.mxu1 %v2431_v13 }
 0x1a4   : > { %1533 = vrot.lane.b32.xlu1 %v1449_v45, %s2429_s29  ;;  %v1321_v50 = vrot.slane %v1319_v43, 1  ;;  %v1446_v59 = vsel %vm567_vm0, %v1444_v53, %v1445_v56 }
 0x1a5   : > { %v1334_v40 = vor.u32 %v1333_v54, %v1329_v57  ;;  %v2320_v54 = vld [vmem:[%s3391_s4 + $0x28] sm:$0xff]  }
 0x1a6   : > { %v1322_v51 = vor.u32 %v1321_v50, %v1317_v47  ;;  %v2319_v47 = vld [vmem:[%s3391_s4 + $0x20] sm:$0xff]  }
 0x1a7   : > { %v1339_v48 = vsel %vm426_vm1, %v1334_v40, %v1338_v61  ;;  %1835 = vmatpush1.bf16.msra.mxu0 %v2319_v47  ;;  %2195 = vmatpush1.bf16.msra.mxu1 %v2319_v47 }
 0x1a8   : > { %1470 = vrot.lane.b32.xlu1 %v1449_v45, %s2427_s9  ;;  %v1327_v55 = vsel %vm426_vm1, %v1322_v51, %v1326_v52  ;;  %1836 = vmatprep.subr.bf16.mxu0 %v2431_v13 }
 0x1a9   : > { %1412 = vrot.lane.b32.xlu0 %v1327_v55, %s3385_s20  ;;  %2187 = vmatprep.subr.bf16.mxu1 %v2431_v13  ;;  %v2321_v55 = vld [vmem:[%s3391_s4 + $0x30] sm:$0xff]  }
 0x1ab   : > { %1837 = vmatpush1.bf16.msra.mxu0 %v2320_v54  ;;  %2196 = vmatpush1.bf16.msra.mxu1 %v2320_v54 }
 0x1ac   : > { %1468 = vrot.lane.b32.xlu1 %v1446_v59, %s2427_s9  ;;  %1838 = vmatprep.subr.bf16.mxu0 %v2431_v13 }
 0x1ad   : > { %2188 = vmatprep.subr.bf16.mxu1 %v2431_v13 }
 0x1af   : > { %1839 = vmatpush1.bf16.msra.mxu0 %v2321_v55  ;;  %2197 = vmatpush1.bf16.msra.mxu1 %v2321_v55 }
 0x1b0   : > { %1513 = vrot.lane.b32.xlu1 %v1339_v48, %s3371_s30  ;;  %v2168_v62 = vpop.f32.mrb[4].mxu0  ;;  %1840 = vmatprep.subr.bf16.mxu0 %v2431_v13  ;;  %s2433_s30 = smov 112  }
 0x1b1   : > { %v1063_v49 = vadd.f32 %v2168_v62, %v2877_v9  ;;  %v1054_v60 = vpop.f32.mrb[5].mxu0  ;;  %2189 = vmatprep.subr.bf16.mxu1 %v2431_v13 }
 0x1b2   : > { %v1055_v63 = vadd.f32 %v2877_v9, %v1054_v60  ;;  %v2169_v2 = vpop.f32.mrb[6].mxu0 }
 0x1b3   : > { %v1123_v4 = vmax.f32 %v1063_v49, 0.0  ;;  %v1066_v5 = vadd.f32 %v2169_v2, %v2877_v9  ;;  %v1057_v6 = vpop.f32.mrb[7].mxu0  ;;  %v2322_v49 = vld [vmem:[%s3391_s4 + $0x38] sm:$0xff]  }
 0x1b4   : > { %v1121_v8 = vmax.f32 %v1055_v63, 0.0  ;;  %v1058_v12 = vadd.f32 %v2877_v9, %v1057_v6  ;;  %1414 = vrot.lane.b32.xlu1 %v1339_v48, %s3385_s20  ;;  %1841 = vmatpush1.bf16.msra.mxu0 %v2322_v49 }
 0x1b5   : > { %v1124_v15 = vmax.f32 %v1066_v5, 0.0  ;;  %v1179_v17 = vsel %vm1166_vm13, 0.0, %v1123_v4  ;;  %2198 = vmatpush1.bf16.msra.mxu1 %v2322_v49  ;;  %1842 = vmatprep.subr.bf16.mxu0 %v2431_v13 }
 0x1b6   : > { %v1122_v16 = vmax.f32 %v1058_v12, 0.0  ;;  %v1177_v20 = vsel %vm1165_vm14, 0.0, %v1121_v8  ;;  %2190 = vmatprep.subr.bf16.mxu1 %v2431_v13 }
 0x1b7   : > { %v1180_v18 = vsel %vm1166_vm13, 0.0, %v1124_v15  ;;  %vm1159_vm13 = vcmp.eq.s32.totalorder %v2881_v10, 6 }
 0x1b8   : > { %v1196_v21 = vpack.c.bf16 %v1180_v18, %v1179_v17  ;;  %v1178_v22 = vsel %vm1165_vm14, 0.0, %v1122_v16  ;;  %1843 = vmatpush1.bf16.msra.mxu0 %v2323_v7  ;;  %vm1170_vm14 = vmor %vm1149_vm9, %vm1160_vm11  ;;  %vm1681_vm11 = vcmask 785408  }
 0x1b9   : > { %v1195_v24 = vpack.c.bf16 %v1178_v22, %v1177_v20  ;;  %2199 = vmatpush1.bf16.msra.mxu1 %v2323_v7  ;;  %vm1169_vm15 = vmor %vm1148_vm12, %vm1159_vm13  ;;  %vm1698_vm12 = vcmask 916480  }
 0x1ba   : > { %v1225_v25 = vshrl.u32 %v1196_v21, 16  ;;  %v1228_v27 = vshll.u32 %v1196_v21, 16 }
 0x1bb   : > { %v1218_v26 = vshrl.u32 %v1195_v24, 16  ;;  %v1221_v14 = vshll.u32 %v1195_v24, 16 }
 0x1bc   : > { %v1227_v3 = vrot.slane %v1225_v25, 7 }
 0x1bd   : > { %v1220_v0 = vrot.slane %v1218_v26, 7 }
 0x1be   : > { %v1230_v29 = vor.u32 %v1228_v27, %v1227_v3  ;;  %v1309_v23 = vsel %vm2891_vm7, %v1227_v3, 0 }
 0x1bf   : > { %v1223_v32 = vor.u32 %v1221_v14, %v1220_v0  ;;  %v2952_v1 = vsel %vm2891_vm7, %v1220_v0, 0  ;;  %v1454_v30 = vrot.slane %v1309_v23, 1  ;;  %v1360_v41 = vshll.u32 %v1309_v23, 16 }
 0x1c0   : > { %v2958_v33 = vsel %vm2891_vm7, 0, %v1230_v29  ;;  %v1451_v43 = vrot.slane %v2952_v1, 1  ;;  %v1348_v0 = vshll.u32 %v2952_v1, 16 }
 0x1c1   : > { %v2965_v35 = vsel %vm2891_vm7, 0, %v1223_v32  ;;  %1552 = vrot.lane.b32.xlu1 %v2958_v33, %s2432_s12  ;;  %v1453_v36 = vrot.slane %v2958_v33, 1  ;;  %v1355_v37 = vshll.u32 %v2958_v33, 16  ;;  %v1353_v45 = vshrl.u32 %v2958_v33, 16 }
 0x1c2   : > { %v1450_v42 = vrot.slane %v2965_v35, 1  ;;  %v1362_v52 = vrot.slane %v1360_v41, 1  ;;  %v1343_v18 = vshll.u32 %v2965_v35, 16  ;;  %v1341_v28 = vshrl.u32 %v2965_v35, 16 }
 0x1c3   : > { %v2974_v44 = vsel %vm567_vm0, %v1453_v36, %v1454_v30  ;;  %v1357_v46 = vrot.slane %v1355_v37, 1  ;;  %v1350_v30 = vrot.slane %v1348_v0, 1 }
 0x1c4   : > { %1474 = vrot.lane.b32.xlu0 %v2974_v44, %s2427_s9  ;;  %v1452_v50 = vsel %vm567_vm0, %v1450_v42, %v1451_v43  ;;  %v1345_v24 = vrot.slane %v1343_v18, 1 }
 0x1c5   : > { %1489 = vrot.lane.b32.xlu1 %v2958_v33, %s2428_s14  ;;  %2130 = vmatprep.mubr.msk.bf16.mxu0 %vm847_vm6, %v1452_v50  ;;  %v1358_v51 = vor.u32 %v1357_v46, %v1353_v45 }
 0x1c6   : > { %v1346_v23 = vor.u32 %v1345_v24, %v1341_v28 }
 0x1c7   : > { %v2989_v53 = vsel %vm426_vm1, %v1358_v51, %v1362_v52 }
 0x1c8   : > { %1418 = vrot.lane.b32.xlu0 %v2989_v53, %s3385_s20  ;;  %v1351_v34 = vsel %vm426_vm1, %v1346_v23, %v1350_v30 }
 0x1c9   : > { %1550 = vrot.lane.b32.xlu1 %v2965_v35, %s2432_s12 }
 0x1cd   : > { %1487 = vrot.lane.b32.xlu1 %v2965_v35, %s2428_s14  ;;  %v2172_v56 = vpop.f32.mrb[8].mxu0 }
 0x1ce   : > { %v1079_v57 = vadd.f32 %v2172_v56, %v2877_v9  ;;  %v1070_v58 = vpop.f32.mrb[9].mxu0 }
 0x1cf   : > { %v1071_v59 = vadd.f32 %v2877_v9, %v1070_v58  ;;  %v2173_v40 = vpop.f32.mrb[10].mxu0 }
 0x1d0   : > { %v1127_v61 = vmax.f32 %v1079_v57, 0.0  ;;  %v1082_v48 = vadd.f32 %v2173_v40, %v2877_v9  ;;  %v1073_v62 = vpop.f32.mrb[11].mxu0 }
 0x1d1   : > { %v1125_v60 = vmax.f32 %v1071_v59, 0.0  ;;  %v1074_v63 = vadd.f32 %v2877_v9, %v1073_v62  ;;  %1537 = vrot.lane.b32.xlu1 %v2974_v44, %s2429_s29 }
 0x1d2   : > { %v1128_v2 = vmax.f32 %v1082_v48, 0.0  ;;  %v1183_v5 = vsel %vm1168_vm5, 0.0, %v1127_v61 }
 0x1d3   : > { %v1126_v4 = vmax.f32 %v1074_v63, 0.0  ;;  %v1181_v8 = vsel %vm1167_vm8, 0.0, %v1125_v60 }
 0x1d4   : > { %v1184_v6 = vsel %vm1168_vm5, 0.0, %v1128_v2  ;;  %vm1161_vm5 = vcmp.eq.s32.totalorder %v2881_v10, 8 }
 0x1d5   : > { %v1198_v12 = vpack.c.bf16 %v1184_v6, %v1183_v5  ;;  %v1182_v15 = vsel %vm1167_vm8, 0.0, %v1126_v4  ;;  %1535 = vrot.lane.b32.xlu1 %v1452_v50, %s2429_s29  ;;  %vm1172_vm8 = vmor %vm1151_vm2, %vm1162_vm3 }
 0x1d6   : > { %v1197_v16 = vpack.c.bf16 %v1182_v15, %v1181_v8  ;;  %vm1171_vm9 = vmor %vm1150_vm4, %vm1161_vm5 }
 0x1d7   : > { %v1239_v17 = vshrl.u32 %v1198_v12, 16  ;;  %v1242_v20 = vshll.u32 %v1198_v12, 16 }
 0x1d8   : > { %v1232_v13 = vshrl.u32 %v1197_v16, 16  ;;  %v1235_v14 = vshll.u32 %v1197_v16, 16 }
 0x1d9   : > { %v1241_v19 = vrot.slane %v1239_v17, 7  ;;  %1472 = vrot.lane.b32.xlu1 %v1452_v50, %s2427_s9 }
 0x1da   : > { %v1234_v25 = vrot.slane %v1232_v13, 7 }
 0x1db   : > { %v1244_v21 = vor.u32 %v1242_v20, %v1241_v19  ;;  %v3034_v22 = vsel %vm2891_vm7, %v1241_v19, 0 }
 0x1dc   : > { %v1460_v27 = vrot.slane %v3034_v22, 1  ;;  %v1237_v32 = vor.u32 %v1235_v14, %v1234_v25  ;;  %v1310_v37 = vsel %vm2891_vm7, %v1234_v25, 0  ;;  %v1384_v60 = vshll.u32 %v3034_v22, 16 }
 0x1dd   : > { %1580 = vrot.lane.b32.xlu1 %v2989_v53, %s2433_s30  ;;  %v3040_v26 = vsel %vm2891_vm7, 0, %v1244_v21  ;;  %v1372_v51 = vshll.u32 %v1310_v37, 16  ;;  %v1457_v54 = vrot.slane %v1310_v37, 1 }
 0x1de   : > { %1556 = vrot.lane.b32.xlu0 %v3040_v26, %s2432_s12  ;;  %v1459_v3 = vrot.slane %v3040_v26, 1  ;;  %v3058_v1 = vsel %vm2891_vm7, 0, %v1237_v32  ;;  %v1379_v45 = vshll.u32 %v3040_v26, 16  ;;  %v1377_v2 = vshrl.u32 %v3040_v26, 16 }
 0x1df   : > { %v1367_v36 = vshll.u32 %v3058_v1, 16  ;;  %v1456_v43 = vrot.slane %v3058_v1, 1  ;;  %v1365_v50 = vshrl.u32 %v3058_v1, 16  ;;  %v1374_v49 = vrot.slane %v1372_v51, 1 }
 0x1e0   : > { %v1461_v29 = vsel %vm567_vm0, %v1459_v3, %v1460_v27  ;;  %v1381_v48 = vrot.slane %v1379_v45, 1  ;;  %v1386_v18 = vrot.slane %v1384_v60, 1 }
 0x1e1   : > { %1517 = vrot.lane.b32.xlu1 %v2989_v53, %s3392_s19  ;;  %2133 = vmatprep.mubr.msk.bf16.mxu1 %vm847_vm6, %v1461_v29  ;;  %v1369_v41 = vrot.slane %v1367_v36, 1  ;;  %v3085_v61 = vsel %vm567_vm0, %v1456_v43, %v1457_v54 }
 0x1e2   : > { %1493 = vrot.lane.b32.xlu0 %v3040_v26, %s2428_s14  ;;  %v1382_v15 = vor.u32 %v1381_v48, %v1377_v2 }
 0x1e3   : > { %v1370_v58 = vor.u32 %v1369_v41, %v1365_v50 }
 0x1e4   : > { %v1387_v21 = vsel %vm426_vm1, %v1382_v15, %v1386_v18 }
 0x1e5   : > { %1578 = vrot.lane.b32.xlu1 %v1351_v34, %s2433_s30  ;;  %v1375_v6 = vsel %vm426_vm1, %v1370_v58, %v1374_v49 }
 0x1e6   : > { %1491 = vrot.lane.b32.xlu0 %v3058_v1, %s2428_s14 }
 0x1e9   : > { %1515 = vrot.lane.b32.xlu1 %v1351_v34, %s3392_s19 }
 0x1ea   : > { %1541 = vrot.lane.b32.xlu0 %v1461_v29, %s2429_s29 }
 0x1ed   : > { %1416 = vrot.lane.b32.xlu1 %v1351_v34, %s3385_s20  ;;  %v2176_v42 = vpop.f32.mrb[12].mxu0 }
 0x1ee   : > { %v1095_v46 = vadd.f32 %v2176_v42, %v2877_v9  ;;  %1478 = vrot.lane.b32.xlu0 %v1461_v29, %s2427_s9  ;;  %v1086_v47 = vpop.f32.mrb[13].mxu0 }
 0x1ef   : > { %v1087_v52 = vadd.f32 %v2877_v9, %v1086_v47  ;;  %v2177_v53 = vpop.f32.mrb[14].mxu0 }
 0x1f0   : > { %v1131_v55 = vmax.f32 %v1095_v46, 0.0  ;;  %v1098_v56 = vadd.f32 %v2177_v53, %v2877_v9  ;;  %v1089_v57 = vpop.f32.mrb[15].mxu0 }
 0x1f1   : > { %v1129_v59 = vmax.f32 %v1087_v52, 0.0  ;;  %v1090_v40 = vadd.f32 %v2877_v9, %v1089_v57  ;;  %1554 = vrot.lane.b32.xlu1 %v3058_v1, %s2432_s12 }
 0x1f2   : > { %v1132_v62 = vmax.f32 %v1098_v56, 0.0  ;;  %1539 = vrot.lane.b32.xlu0 %v3085_v61, %s2429_s29  ;;  %v1187_v4 = vsel %vm1170_vm14, 0.0, %v1131_v55 }
 0x1f3   : > { %v1130_v63 = vmax.f32 %v1090_v40, 0.0  ;;  %v1185_v7 = vsel %vm1169_vm15, 0.0, %v1129_v59 }
 0x1f4   : > { %v1188_v5 = vsel %vm1170_vm14, 0.0, %v1132_v62 }
 0x1f5   : > { %v1200_v8 = vpack.c.bf16 %v1188_v5, %v1187_v4  ;;  %v1186_v12 = vsel %vm1169_vm15, 0.0, %v1130_v63  ;;  %1582 = vrot.lane.b32.xlu1 %v1375_v6, %s2433_s30 }
 0x1f6   : > { %v1199_v16 = vpack.c.bf16 %v1186_v12, %v1185_v7  ;;  %1476 = vrot.lane.b32.xlu0 %v3085_v61, %s2427_s9 }
 0x1f7   : > { %v1253_v17 = vshrl.u32 %v1200_v8, 16  ;;  %v1256_v13 = vshll.u32 %v1200_v8, 16 }
 0x1f8   : > { %v1246_v19 = vshrl.u32 %v1199_v16, 16  ;;  %v1249_v24 = vshll.u32 %v1199_v16, 16 }
 0x1f9   : > { %v1255_v20 = vrot.slane %v1253_v17, 7 }
 0x1fa   : > { %v1248_v22 = vrot.slane %v1246_v19, 7  ;;  %1584 = vrot.lane.b32.xlu0 %v1387_v21, %s2433_s30 }
 0x1fb   : > { %v1258_v25 = vor.u32 %v1256_v13, %v1255_v20  ;;  %v3115_v32 = vsel %vm2891_vm7, %v1255_v20, 0 }
 0x1fc   : > { %v1251_v3 = vor.u32 %v1249_v24, %v1248_v22  ;;  %v3099_v27 = vsel %vm2891_vm7, %v1248_v22, 0  ;;  %v1408_v37 = vshll.u32 %v3115_v32, 16  ;;  %v1466_v15 = vrot.slane %v3115_v32, 1 }
 0x1fd   : > { %v3103_v28 = vsel %vm2891_vm7, 0, %v1258_v25  ;;  %v1463_v23 = vrot.slane %v3099_v27, 1  ;;  %v1396_v17 = vshll.u32 %v3099_v27, 16 }
 0x1fe   : > { %v3107_v0 = vsel %vm2891_vm7, 0, %v1251_v3  ;;  %1521 = vrot.lane.b32.xlu0 %v1387_v21, %s3392_s19  ;;  %v1403_v14 = vshll.u32 %v3103_v28, 16  ;;  %v1401_v36 = vshrl.u32 %v3103_v28, 16  ;;  %v1410_v42 = vrot.slane %v1408_v37, 1 }
 0x1ff   : > { %v1462_v29 = vrot.slane %v3107_v0, 1  ;;  %v1391_v62 = vshll.u32 %v3107_v0, 16  ;;  %v1465_v5 = vrot.slane %v3103_v28, 1  ;;  %v1389_v16 = vshrl.u32 %v3107_v0, 16 }
 0x200   : > { %v1405_v34 = vrot.slane %v1403_v14, 1  ;;  %v1398_v3 = vrot.slane %v1396_v17, 1 }
 0x201   : > { %v3118_v30 = vsel %vm567_vm0, %v1462_v29, %v1463_v23 }
 0x202   : > { %1422 = vrot.lane.b32.xlu0 %v1387_v21, %s3385_s20  ;;  %1543 = vrot.lane.b32.xlu1 %v3118_v30, %s2429_s29  ;;  %v1406_v41 = vor.u32 %v1405_v34, %v1401_v36  ;;  %v3163_v21 = vsel %vm567_vm0, %v1465_v5, %v1466_v15 }
 0x204   : > { %v1411_v43 = vsel %vm426_vm1, %v1406_v41, %v1410_v42 }
 0x206   : > { %1519 = vrot.lane.b32.xlu0 %v1375_v6, %s3392_s19  ;;  %1480 = vrot.lane.b32.xlu1 %v3118_v30, %s2427_s9 }
 0x20a   : > { %1420 = vrot.lane.b32.xlu0 %v1375_v6, %s3385_s20  ;;  %1588 = vrot.lane.b32.xlu1 %v1411_v43, %s2433_s30  ;;  %v1393_v6 = vrot.slane %v1391_v62, 1 }
 0x20c   : > { %v1394_v22 = vor.u32 %v1393_v6, %v1389_v16 }
 0x20d   : > { %v2180_v45 = vpop.f32.mrb[16].mxu0 }
 0x20e   : > { %v1111_v46 = vadd.f32 %v2180_v45, %v2877_v9  ;;  %1560 = vrot.lane.b32.xlu0 %v3103_v28, %s2432_s12  ;;  %1525 = vrot.lane.b32.xlu1 %v1411_v43, %s3392_s19  ;;  %v1102_v47 = vpop.f32.mrb[17].mxu0  ;;  %v1399_v23 = vsel %vm426_vm1, %v1394_v22, %v1398_v3 }
 0x20f   : > { %v1103_v50 = vadd.f32 %v2877_v9, %v1102_v47  ;;  %v2181_v51 = vpop.f32.mrb[18].mxu0 }
 0x210   : > { %v1135_v52 = vmax.f32 %v1111_v46, 0.0  ;;  %v1114_v53 = vadd.f32 %v2181_v51, %v2877_v9  ;;  %v1105_v54 = vpop.f32.mrb[19].mxu0 }
 0x211   : > { %v1133_v55 = vmax.f32 %v1103_v50, 0.0  ;;  %v1106_v56 = vadd.f32 %v2877_v9, %v1105_v54 }
 0x212   : > { %v1136_v57 = vmax.f32 %v1114_v53, 0.0  ;;  %1497 = vrot.lane.b32.xlu0 %v3103_v28, %s2428_s14  ;;  %1426 = vrot.lane.b32.xlu1 %v1411_v43, %s3385_s20  ;;  %v1191_v11 = vsel %vm1172_vm8, 0.0, %v1135_v52 }
 0x213   : > { %v1134_v58 = vmax.f32 %v1106_v56, 0.0  ;;  %v1189_v10 = vsel %vm1171_vm9, 0.0, %v1133_v55 }
 0x214   : > { %v1192_v59 = vsel %vm1172_vm8, 0.0, %v1136_v57 }
 0x215   : > { %v1202_v40 = vpack.c.bf16 %v1192_v59, %v1191_v11  ;;  %v1190_v48 = vsel %vm1171_vm9, 0.0, %v1134_v58 }
 0x216   : > { %v1201_v49 = vpack.c.bf16 %v1190_v48, %v1189_v10  ;;  %1558 = vrot.lane.b32.xlu0 %v3107_v0, %s2432_s12  ;;  %v3148_v60 = vpop.permute.xlu1 %1533 }
 0x217   : > { %v1267_v9 = vshrl.u32 %v1202_v40, 16  ;;  %v1270_v4 = vshll.u32 %v1202_v40, 16  ;;  %v1486_v40 = vpop.permute.xlu0 %1485 }
 0x218   : > { %v1260_v63 = vshrl.u32 %v1201_v49, 16  ;;  %v1263_v8 = vshll.u32 %v1201_v49, 16 }
 0x219   : > { %v1269_v2 = vrot.slane %v1267_v9, 7 }
 0x21a   : > { %v1262_v7 = vrot.slane %v1260_v63, 7  ;;  %1495 = vrot.lane.b32.xlu0 %v3107_v0, %s2428_s14  ;;  %v3160_v13 = vpop.permute.xlu1 %1470 }
 0x21b   : > { %v1272_v12 = vor.u32 %v1270_v4, %v1269_v2  ;;  %v1315_v20 = vsel %vm2891_vm7, %v1269_v2, 0  ;;  %v1413_v62 = vpop.permute.xlu0 %1412 }
 0x21c   : > { %v1265_v18 = vor.u32 %v1263_v8, %v1262_v7  ;;  %v1596_v14 = vrot.slane %v1315_v20, 1  ;;  %v1314_v29 = vsel %vm2891_vm7, %v1262_v7, 0  ;;  %v1574_v43 = vshll.u32 %v1315_v20, 16 }
 0x21d   : > { %v1305_v19 = vsel %vm2891_vm7, 0, %v1272_v12  ;;  %v1531_v41 = vrot.slane %v1314_v29, 1  ;;  %v1509_v54 = vshll.u32 %v1314_v29, 16  ;;  %v1599_v5 = vsel %vm847_vm6, %v2905_v39, %v1413_v62 }
 0x21e   : > { %1545 = vrot.lane.b32.xlu0 %v3163_v21, %s2429_s29  ;;  %v1304_v24 = vsel %vm2891_vm7, 0, %v1265_v18  ;;  %v1569_v25 = vshll.u32 %v1305_v19, 16  ;;  %v1595_v27 = vrot.slane %v1305_v19, 1  ;;  %v1469_v37 = vpop.permute.xlu1 %1468  ;;  %v1567_v42 = vshrl.u32 %v1305_v19, 16 }
 0x21f   : > { %1562 = vrot.lane.b32.xlu1 %v1304_v24, %s2432_s12  ;;  %v1530_v32 = vrot.slane %v1304_v24, 1  ;;  %v1504_v45 = vshll.u32 %v1304_v24, 16  ;;  %v1576_v47 = vrot.slane %v1574_v43, 1  ;;  %v1502_v53 = vshrl.u32 %v1304_v24, 16 }
 0x220   : > { %v1571_v34 = vrot.slane %v1569_v25, 1  ;;  %v3175_v36 = vsel %vm567_vm0, %v1595_v27, %v1596_v14  ;;  %v1511_v57 = vrot.slane %v1509_v54, 1  ;;  %v1615_v6 = vsel %vm931_vm10, %v1599_v5, %v1469_v37 }
 0x221   : > { %v3180_v31 = vsel %vm567_vm0, %v1530_v32, %v1531_v41  ;;  %v1506_v51 = vrot.slane %v1504_v45, 1  ;;  %vm1630_vm0 = vcmask 392192   ;;  %vm1664_vm7 = vcmask 654336  }
 0x222   : > { %1586 = vrot.lane.b32.xlu0 %v1399_v23, %s2433_s30  ;;  %v1572_v46 = vor.u32 %v1571_v34, %v1567_v42  ;;  %v1514_v50 = vpop.permute.xlu1 %1513  ;;  %v1632_v12 = vsel %vm1630_vm0, %v1615_v6, %v1486_v40 }
 0x223   : > { %1499 = vrot.lane.b32.xlu1 %v1304_v24, %s2428_s14  ;;  %v1507_v55 = vor.u32 %v1506_v51, %v1502_v53  ;;  %s2080_s14 = sshll.u32 %s2544_s16, 1 }
 0x224   : > { %v1577_v52 = vsel %vm426_vm1, %v1572_v46, %v1576_v47 }
 0x225   : > { %v1512_v58 = vsel %vm426_vm1, %v1507_v55, %v1511_v57  ;;  %vm1647_vm1 = vcmask 523264  }
 0x226   : > { %1523 = vrot.lane.b32.xlu0 %v1399_v23, %s3392_s19  ;;  %v1415_v56 = vpop.permute.xlu1 %1414  ;;  %v1649_v15 = vsel %vm1647_vm1, %v1632_v12, %v1514_v50 }
 0x227   : > { %1547 = vrot.lane.b32.xlu1 %v3180_v31, %s2429_s29  ;;  %v1666_v18 = vsel %vm1664_vm7, %v1649_v15, %v3148_v60  ;;  %v1601_v39 = vsel %vm847_vm6, %v2901_v38, %v1415_v56  ;;  %s306_s29 = sadd.s32 %s2080_s14, %s2547_s17 }
 0x228   : > { %v1617_v25 = vsel %vm931_vm10, %v1601_v39, %v3160_v13  ;;  %s2081_s13 = sshll.u32 %s306_s29, 2 }
 0x22a   : > { %1424 = vrot.lane.b32.xlu0 %v1399_v23, %s3385_s20  ;;  %s308_s20 = scalar_lea.vmem %s3357_s1, %s2081_s13 }
 0x22b   : > { %1592 = vrot.lane.b32.xlu1 %v1577_v52, %s2433_s30 }
 0x22e   : > { %1482 = vrot.lane.b32.xlu0 %v3163_v21, %s2427_s9 }
 0x232   : > { %1590 = vrot.lane.b32.xlu0 %v1512_v58, %s2433_s30  ;;  %s2139_s30 = sshll.u32 %s2406_s25, 1 }
 0x233   : > { %v1553_v11 = vpop.permute.xlu1 %1552  ;;  %s1970_s0 = sadd.s32 %s2402_s24, %s2139_s30 }
 0x234   : > { %s2140_s2 = sshll.u32 %s1970_s0, 6  ;;  %s2434_s0 = smov [#allocation2]  }
 0x235   : > { %s3303_s16 = scalar_lea.hbm %s3362_s6, %s2140_s2  ;;  %s2328_s24 = sshll.u32 %s2434_s0, 4  ;;  %s2329_s24 = int_to_ptr.vmem [resolvable:$false] %s2328_s24 }
 0x236   : > { %1527 = vrot.lane.b32.xlu0 %v1512_v58, %s3392_s19  ;;  %v1475_v9 = vpop.permute.xlu0 %1474  ;;  %s2330_s14 = scalar_lea.vmem %s2329_s24, 128 }
 0x237   : > { %v1490_v59 = vpop.permute.xlu1 %1489 }
 0x23a   : > { %1564 = vrot.lane.b32.xlu0 %v1305_v19, %s2432_s12  ;;  %v1419_v4 = vpop.permute.xlu0 %1418  ;;  %s289_s12 = sand.u32 1, %s2394_s22  }
 0x23b   : > { %v1551_v10 = vpop.permute.xlu1 %1550  ;;  %v1605_v53 = vsel %vm847_vm6, %v2958_v33, %v1419_v4  ;;  %s2078_s18 = sshll.u32 %s289_s12, 2  ;;  %s1959_s25 = scalar_lea.sflag [#allocation3], %s289_s12 }
 0x23c   : > { %v1683_v19 = vsel %vm1681_vm11, %v1666_v18, %v1551_v10  ;;  %s291_s3 = scalar_lea.vmem [#allocation2], %s2078_s18 }
 0x23d   : > { %s1974_s4 = sshll.u32 %s291_s3, 4  ;;  %s3305_s4 = int_to_ptr.vmem [resolvable:$true] %s1974_s4 }
 0x23e   : > { %s2324_s17 = scalar_lea.vmem %s3305_s4, 64  ;;  %p2331_p6 = scmp.lt.s32.totalorder %s3305_s4, %s2329_s24 }
 0x23f   : > { %v1488_v48 = vpop.permute.xlu1 %1487  ;;  %p2325_p2 = scmp.ne.s32.totalorder %s3305_s4, %s2324_s17  ;;  %p2332_p7 = scmp.lt.s32.totalorder %s2330_s14, %s2324_s17 }
 0x240   : > { %v1634_v3 = vsel %vm1630_vm0, %v1617_v25, %v1488_v48 }
 0x241   : > { %p2326_p4 = pnand %p2325_p2, %p2521_p3  ;;  %p2333_p9 = por %p2332_p7, %p2331_p6 }
 0x243   : > { %v1538_v49 = vpop.permute.xlu1 %1537  ;;  %p2327_p5 = pneg %p2326_p4 }
 0x245   : > { %p2334_p10 = pnand %p2333_p9, %p2327_p5 }
 0x247   : > { %v1536_v63 = vpop.permute.xlu1 %1535 }
 0x24b   : > { %v1473_v2 = vpop.permute.xlu1 %1472 }
 0x24f   : > { %v1581_v7 = vpop.permute.xlu1 %1580 }
 0x250   : > { %v1557_v8 = vpop.permute.xlu0 %1556 }
 0x253   : > { %v1518_v16 = vpop.permute.xlu1 %1517 }
 0x254   : > { %v1494_v17 = vpop.permute.xlu0 %1493 }
 0x257   : > { %v1579_v20 = vpop.permute.xlu1 %1578 }
 0x258   : > { %v1700_v22 = vsel %vm1698_vm12, %v1683_v19, %v1579_v20  ;;  %v1492_v24 = vpop.permute.xlu0 %1491 }
 0x259   : > { %1859 = vmatmul.mubr.bf16.vlgmr.msra.gmra.mrb[20].mxu0 %v1700_v22 }
 0x25a   : > { %2131 = vmatprep.mubr.msk.bf16.mxu0 %vm847_vm6, %v2974_v44 }
 0x25b   : > { %v1516_v27 = vpop.permute.xlu1 %1515 }
 0x25c   : > { %v1651_v60 = vsel %vm1647_vm1, %v1634_v3, %v1516_v27  ;;  %v1542_v14 = vpop.permute.xlu0 %1541 }
 0x25d   : > { %v1668_v38 = vsel %vm1664_vm7, %v1651_v60, %v1536_v63 }
 0x25e   : > { %v1685_v29 = vsel %vm1681_vm11, %v1668_v38, %v1553_v11 }
 0x25f   : > { %v1417_v23 = vpop.permute.xlu1 %1416  ;;  %v1703_v32 = vsel %vm1698_vm12, %v1685_v29, %v1581_v7 }
 0x260   : > { %v1603_v34 = vsel %vm847_vm6, %v2965_v35, %v1417_v23  ;;  %v1479_v13 = vpop.permute.xlu0 %1478 }
 0x261   : > { %v1619_v37 = vsel %vm931_vm10, %v1603_v34, %v1473_v2  ;;  %1867 = vmatmul.mubr.bf16.gmra.mrb[24].mxu0 %v1703_v32 }
 0x262   : > { %v1636_v44 = vsel %vm1630_vm0, %v1619_v37, %v1490_v59  ;;  %2132 = vmatprep.mubr.msk.bf16.mxu0 %vm847_vm6, %v3085_v61  ;;  %v1621_v61 = vsel %vm931_vm10, %v1605_v53, %v1475_v9 }
 0x263   : > { %v1653_v41 = vsel %vm1647_vm1, %v1636_v44, %v1518_v16  ;;  %v1555_v42 = vpop.permute.xlu1 %1554  ;;  %v1638_v55 = vsel %vm1630_vm0, %v1621_v61, %v1492_v24 }
 0x264   : > { %v1670_v43 = vsel %vm1664_vm7, %v1653_v41, %v1538_v49  ;;  %v1540_v45 = vpop.permute.xlu0 %1539 }
 0x265   : > { %v1687_v46 = vsel %vm1681_vm11, %v1670_v43, %v1555_v42 }
 0x267   : > { %v1583_v47 = vpop.permute.xlu1 %1582 }
 0x268   : > { %v1477_v50 = vpop.permute.xlu0 %1476  ;;  %v1706_v35 = vsel %vm1698_vm12, %v1687_v46, %v1583_v47 }
 0x269   : > { %1875 = vmatmul.mubr.bf16.gmra.mrb[28].mxu0 %v1706_v35 }
 0x26c   : > { %v1585_v51 = vpop.permute.xlu0 %1584 }
 0x270   : > { %v1522_v52 = vpop.permute.xlu0 %1521 }
 0x274   : > { %v1423_v54 = vpop.permute.xlu0 %1422  ;;  %v1544_v33 = vpop.permute.xlu1 %1543 }
 0x275   : > { %v1609_v12 = vsel %vm847_vm6, %v3040_v26, %v1423_v54 }
 0x276   : > { %v1625_v39 = vsel %vm931_vm10, %v1609_v12, %v1479_v13 }
 0x278   : > { %v1520_v56 = vpop.permute.xlu0 %1519  ;;  %v1481_v62 = vpop.permute.xlu1 %1480 }
 0x279   : > { %v1655_v57 = vsel %vm1647_vm1, %v1638_v55, %v1520_v56 }
 0x27a   : > { %v1672_v58 = vsel %vm1664_vm7, %v1655_v57, %v1540_v45 }
 0x27b   : > { %v1689_v11 = vsel %vm1681_vm11, %v1672_v58, %v1557_v8 }
 0x27c   : > { %v1421_v59 = vpop.permute.xlu0 %1420  ;;  %v1709_v10 = vsel %vm1698_vm12, %v1689_v11, %v1585_v51  ;;  %v1589_v2 = vpop.permute.xlu1 %1588 }
 0x27d   : > { %1883 = vmatmul.mubr.bf16.vlgmr.msra.gmra.mrb[0].mxu1 %v1709_v10  ;;  %v1607_v49 = vsel %vm847_vm6, %v3058_v1, %v1421_v59 }
 0x27e   : > { %2134 = vmatprep.mubr.msk.bf16.mxu1 %vm847_vm6, %v3118_v30  ;;  %v1623_v63 = vsel %vm931_vm10, %v1607_v49, %v1477_v50  ;;  %v3274_v50 = vld [vmem:[%s3393_s5] ss:$0 sm:$0xff] }
 0x27f   : > { %v1640_v5 = vsel %vm1630_vm0, %v1623_v63, %v1494_v17 }
 0x280   : > { %v1561_v40 = vpop.permute.xlu0 %1560  ;;  %v1657_v6 = vsel %vm1647_vm1, %v1640_v5, %v1522_v52  ;;  %v1526_v8 = vpop.permute.xlu1 %1525 }
 0x281   : > { %v1674_v30 = vsel %vm1664_vm7, %v1657_v6, %v1542_v14 }
 0x284   : > { %v1498_v48 = vpop.permute.xlu0 %1497  ;;  %v1427_v18 = vpop.permute.xlu1 %1426 }
 0x285   : > { %v1613_v32 = vsel %vm847_vm6, %v3103_v28, %v1427_v18 }
 0x288   : > { %v1559_v9 = vpop.permute.xlu0 %1558 }
 0x289   : > { %v1691_v15 = vsel %vm1681_vm11, %v1674_v30, %v1559_v9 }
 0x28c   : > { %v1496_v4 = vpop.permute.xlu0 %1495 }
 0x28d   : > { %v1642_v17 = vsel %vm1630_vm0, %v1625_v39, %v1496_v4 }
 0x290   : > { %v1546_v7 = vpop.permute.xlu0 %1545 }
 0x291   : > { %v1563_v26 = vpop.permute.xlu1 %1562 }
 0x294   : > { %v1587_v16 = vpop.permute.xlu0 %1586 }
 0x295   : > { %v1712_v1 = vsel %vm1698_vm12, %v1691_v15, %v1587_v16  ;;  %v1500_v29 = vpop.permute.xlu1 %1499 }
 0x296   : > { %1891 = vmatmul.mubr.bf16.gmra.mrb[4].mxu1 %v1712_v1 }
 0x297   : > { %2135 = vmatprep.mubr.msk.bf16.mxu1 %vm847_vm6, %v3163_v21 }
 0x298   : > { %v1524_v19 = vpop.permute.xlu0 %1523 }
 0x299   : > { %v1659_v20 = vsel %vm1647_vm1, %v1642_v17, %v1524_v19  ;;  %v1548_v44 = vpop.permute.xlu1 %1547 }
 0x29a   : > { %v1676_v22 = vsel %vm1664_vm7, %v1659_v20, %v1544_v33 }
 0x29b   : > { %v1693_v24 = vsel %vm1681_vm11, %v1676_v22, %v1561_v40 }
 0x29c   : > { %v1425_v25 = vpop.permute.xlu0 %1424  ;;  %v1715_v3 = vsel %vm1698_vm12, %v1693_v24, %v1589_v2 }
 0x29d   : > { %v1611_v27 = vsel %vm847_vm6, %v3107_v0, %v1425_v25  ;;  %v1593_v45 = vpop.permute.xlu1 %1592 }
 0x29e   : > { %v1627_v60 = vsel %vm931_vm10, %v1611_v27, %v1481_v62  ;;  %1899 = vmatmul.mubr.bf16.gmra.mrb[8].mxu1 %v1715_v3 }
 0x29f   : > { %v1644_v21 = vsel %vm1630_vm0, %v1627_v60, %v1498_v48  ;;  %2136 = vmatprep.mubr.msk.bf16.mxu1 %vm847_vm6, %v3180_v31 }
 0x2a0   : > { %v1483_v14 = vpop.permute.xlu0 %1482  ;;  %v1661_v38 = vsel %vm1647_vm1, %v1644_v21, %v1526_v8 }
 0x2a1   : > { %v1678_v23 = vsel %vm1664_vm7, %v1661_v38, %v1546_v7  ;;  %v1629_v13 = vsel %vm931_vm10, %v1613_v32, %v1483_v14 }
 0x2a2   : > { %v1695_v0 = vsel %vm1681_vm11, %v1678_v23, %v1563_v26  ;;  %v1646_v31 = vsel %vm1630_vm0, %v1629_v13, %v1500_v29  ;;  %v1955_v23 = vld [vmem:[%s308_s20] sm:$0xf] }
 0x2a4   : > { %v1591_v34 = vpop.permute.xlu0 %1590 }
 0x2a5   : > { %v1718_v37 = vsel %vm1698_vm12, %v1695_v0, %v1591_v34 }
 0x2a6   : > { %1907 = vmatmul.mubr.bf16.gmra.mrb[12].mxu1 %v1718_v37 }
 0x2a7   : > { %2137 = vmatprep.mubr.msk.bf16.mxu1 %vm847_vm6, %v3175_v36 }
 0x2a8   : > { %v1528_v41 = vpop.permute.xlu0 %1527 }
 0x2a9   : > { %v1663_v42 = vsel %vm1647_vm1, %v1646_v31, %v1528_v41 }
 0x2aa   : > { %v1680_v43 = vsel %vm1664_vm7, %v1663_v42, %v1548_v44 }
 0x2ac   : > { %v1565_v28 = vpop.permute.xlu0 %1564 }
 0x2ad   : > { %v1697_v46 = vsel %vm1681_vm11, %v1680_v43, %v1565_v28 }
 0x2ae   : > { %v1721_v47 = vsel %vm1698_vm12, %v1697_v46, %v1593_v45 }
 0x2af   : > { %1915 = vmatmul.mubr.bf16.gmra.mrb[16].mxu1 %v1721_v47 }
 0x32c   : > { %v1860_v36 = vpop.f32.mrb[20].mxu0 }
 0x32d   : > { %v1861_v35 = vadd.f32 %v3274_v50, %v1860_v36  ;;  %v1862_v51 = vpop.f32.mrb[21].mxu0 }
 0x32e   : > { %v1863_v52 = vpop.f32.mrb[22].mxu0 }
 0x32f   : > { %v1865_v53 = vpop.f32.mrb[23].mxu0  ;;  %1923 = vxpose.xlu0.b32.start [1/16] (narrow) %v1861_v35, 8  ;;  %v1864_v54 = vadd.f32 %v3274_v50, %v1863_v52 }
 0x333   : > { %1924 = vxpose.xlu0.b32.cont [2/16] (narrow) %v1864_v54, 8 }
 0x334   : > { %v1868_v61 = vpop.f32.mrb[24].mxu0 }
 0x335   : > { %v1869_v55 = vadd.f32 %v3274_v50, %v1868_v61  ;;  %v1870_v56 = vpop.f32.mrb[25].mxu0 }
 0x336   : > { %v1871_v57 = vpop.f32.mrb[26].mxu0 }
 0x337   : > { %v1873_v58 = vpop.f32.mrb[27].mxu0  ;;  %1925 = vxpose.xlu0.b32.cont [3/16] (narrow) %v1869_v55, 8  ;;  %v1872_v11 = vadd.f32 %v3274_v50, %v1871_v57 }
 0x33b   : > { %1926 = vxpose.xlu0.b32.cont [4/16] (narrow) %v1872_v11, 8 }
 0x33c   : > { %v1876_v59 = vpop.f32.mrb[28].mxu0 }
 0x33d   : > { %v1877_v10 = vadd.f32 %v3274_v50, %v1876_v59  ;;  %v1878_v33 = vpop.f32.mrb[29].mxu0 }
 0x33e   : > { %v1879_v40 = vpop.f32.mrb[30].mxu0 }
 0x33f   : > { %v1881_v48 = vpop.f32.mrb[31].mxu0  ;;  %1927 = vxpose.xlu0.b32.cont [5/16] (narrow) %v1877_v10, 8  ;;  %v1880_v62 = vadd.f32 %v3274_v50, %v1879_v40 }
 0x343   : > { %1928 = vxpose.xlu0.b32.cont [6/16] (narrow) %v1880_v62, 8 }
 0x350   : > { %v1884_v49 = vpop.f32.mrb[0].mxu1 }
 0x351   : > { %v1885_v9 = vadd.f32 %v3274_v50, %v1884_v49  ;;  %v1886_v63 = vpop.f32.mrb[1].mxu1 }
 0x352   : > { %v1887_v2 = vpop.f32.mrb[2].mxu1 }
 0x353   : > { %v1889_v4 = vpop.f32.mrb[3].mxu1  ;;  %1929 = vxpose.xlu0.b32.cont [7/16] (narrow) %v1885_v9, 8  ;;  %v1888_v5 = vadd.f32 %v3274_v50, %v1887_v2 }
 0x357   : > { %1930 = vxpose.xlu0.b32.cont [8/16] (narrow) %v1888_v5, 8 }
 0x369   : > { %v1892_v6 = vpop.f32.mrb[4].mxu1 }
 0x36a   : > { %v1893_v7 = vadd.f32 %v3274_v50, %v1892_v6  ;;  %v1894_v8 = vpop.f32.mrb[5].mxu1 }
 0x36b   : > { %v1895_v30 = vpop.f32.mrb[6].mxu1 }
 0x36c   : > { %v1897_v12 = vpop.f32.mrb[7].mxu1  ;;  %1931 = vxpose.xlu0.b32.cont [9/16] (narrow) %v1893_v7, 8  ;;  %v1896_v15 = vadd.f32 %v3274_v50, %v1895_v30 }
 0x370   : > { %1932 = vxpose.xlu0.b32.cont [10/16] (narrow) %v1896_v15, 8 }
 0x371   : > { %v1900_v16 = vpop.f32.mrb[8].mxu1 }
 0x372   : > { %v1901_v1 = vadd.f32 %v3274_v50, %v1900_v16  ;;  %v1902_v18 = vpop.f32.mrb[9].mxu1 }
 0x373   : > { %v1903_v39 = vpop.f32.mrb[10].mxu1 }
 0x374   : > { %v1905_v17 = vpop.f32.mrb[11].mxu1  ;;  %1933 = vxpose.xlu0.b32.cont [11/16] (narrow) %v1901_v1, 8  ;;  %v1904_v19 = vadd.f32 %v3274_v50, %v1903_v39 }
 0x378   : > { %1934 = vxpose.xlu0.b32.cont [12/16] (narrow) %v1904_v19, 8 }
 0x379   : > { %v1908_v20 = vpop.f32.mrb[12].mxu1 }
 0x37a   : > { %v1909_v22 = vadd.f32 %v3274_v50, %v1908_v20  ;;  %v1910_v26 = vpop.f32.mrb[13].mxu1 }
 0x37b   : > { %v1911_v24 = vpop.f32.mrb[14].mxu1 }
 0x37c   : > { %v1913_v25 = vpop.f32.mrb[15].mxu1  ;;  %1935 = vxpose.xlu0.b32.cont [13/16] (narrow) %v1909_v22, 8  ;;  %v1912_v3 = vadd.f32 %v3274_v50, %v1911_v24 }
 0x380   : > { %1936 = vxpose.xlu0.b32.cont [14/16] (narrow) %v1912_v3, 8 }
 0x382   : > { %v1916_v27 = vpop.f32.mrb[16].mxu1 }
 0x383   : > { %v1917_v60 = vadd.f32 %v3274_v50, %v1916_v27  ;;  %v1918_v21 = vpop.f32.mrb[17].mxu1 }
 0x384   : > { %v1919_v14 = vpop.f32.mrb[18].mxu1 }
 0x385   : > { %v1921_v38 = vpop.f32.mrb[19].mxu1  ;;  %1937 = vxpose.xlu0.b32.cont [15/16] (narrow) %v1917_v60, 8  ;;  %v1920_v29 = vadd.f32 %v3274_v50, %v1919_v14 }
 0x389   : > { %1938 = vxpose.xlu0.b32.end [16/16] (narrow) %v1920_v29, 8 }
 0x3cd   : > { %v1939_v32 = vpop.trf.xlu0 }
 0x3ce   : > { %v1956_v34 = vadd.f32 %v1955_v23, %v1939_v32 }
 0x3d0   : > { %1957 = vst [vmem:[%s291_s3] sm:$0xf] %v1956_v34 }
 0x3d1   : > { %2337 = shalt.err (!%p2334_p10)
}
 0x3d2   : > { %s2338_s2 = scalar_lea.hbm %s3303_s16, 64  ;;  %s2342_s8 = scalar_lea.hbm %s3362_s6, 256 }
 0x3d3   : > { %p2339_p11 = scmp.ne.s32.totalorder %s3303_s16, %s2338_s2  ;;  %p2343_p0 = scmp.lt.u32.totalorder %s3303_s16, %s3362_s6 }
 0x3d4   : > { %p2344_p1 = scmp.lt.u32.totalorder %s2342_s8, %s2338_s2  ;;  %p2346_p4 = scmp.lt.u32.totalorder %s2338_s2, %s3303_s16 }
 0x3d5   : > { %p2340_p12 = pnand %p2339_p11, %p2521_p3 }
 0x3d6   : > { %p2345_p2 = por %p2344_p1, %p2343_p0 }
 0x3d7   : > { %p2341_p13 = pneg %p2340_p12 }
 0x3d8   : > { %p2347_p5 = por %p2346_p4, %p2345_p2 }
 0x3da   : > { %p2348_p6 = pnand %p2347_p5, %p2341_p13 }
 0x3dc   : > { %2351 = shalt.err (!%p2348_p6)
}
 0x3dd   : > { %2203 = dma.vmem_to_hbm [thread:$0]  (%p2521_p3), %s3305_s4, 64, %s3303_s16, %s1959_s25  }
 0x3de PF: > { %p2209_p7 = scmp.ge.s32.totalorder %s2418_s28, 2  ;;  %s1986_s13 = sand.u32 1, %s2390_s21  }
 0x3df   : > { %s1987_s18 = scalar_lea.sflag [#allocation3], %s1986_s13 }
 0x3e0   : > { %p2206_p9 = pnand %p2209_p7, %p2530_p8 }
 0x3e2   : > { %2385 = dma.done.wait (!%p2206_p9), %s1987_s18, 64  }
 0x3e3   : > { %2387 = vsyncadd (!%p2206_p9), %s1987_s18, 4294967232  ;;  %s19_s28 = sadd.s32 1, %s2418_s28   ;;  %s3394_s4 = sld [smem:[#allocation5_spill]] }
 0x3e4   : > { %p16_p10 = scmp.ge.s32.totalorder %s19_s28, 6   ;;  %s3395_s21 = smov %s2394_s22 }
 0x3e5   : > { %s3396_s22 = smov %s2398_s23  ;;  %s3397_s23 = smov %s2539_s15 }
 0x3e6   : > { %s3398_s24 = smov %s2410_s26  ;;  %s3399_s25 = smov %s2414_s27 }
 0x3e7   : > { %s3400_s26 = smov %s3403_s7  ;;  %18 = sbr.rel (!%p16_p10) target bundleno = 11 (0xb), region = 82 }
 0x3e9   : > { %s3401_s27 = smov %s3394_s4 }
 0x3ee   :  { %1992 = vsyncpa [#allocation3], 1 }
 0x3ef   :  { %1994 = vsyncpa [#allocation3 + $0x1], 1 }

</bundles_post_ra>
